<compile_context>
chip_gen: v6e
topology: v6e:2x2x1
jax: 0.10.0
libtpu: 0.0.40
codegen_flags: <defaults>
</compile_context>

<pallas_src>
import jax
import jax.numpy as jnp
from jax.experimental import pallas as pl
from jax.experimental.pallas import tpu as pltpu

# ---------------- model configuration (small, consistent with the module) ----
EMBED_DIM = 32            # embedding_dim
SEQ_LEN = 8               # token sequence length
SEQ_VOCAB = 64            # vocab size of the sequence column
CHAR_LEN = 8              # character sequence length
CHAR_VOCAB = 32           # vocab size of the char column
CHAR_IN = EMBED_DIM // 2  # char embedding dim (GRU input size)
VEC_DIM = 64              # raw vector feature dimension
SCALAR_DIM = 2            # number of scalar features
HIDDEN_DIMS = (128, 64)   # classifier hidden dims
N_CLASSES = 2
PAD_IDX = 0
LANE_OUT = 128            # lane-dense padded output width

_VMEM = pl.BlockSpec(memory_space=pltpu.MemorySpace.VMEM)


# ----------------- single f32 weight slab: row layout (static) ---------------
def _build_weight_layout():
    spec = [
        # name        rows                 cols
        ("wih",      CHAR_VOCAB,      3 * EMBED_DIM),   # char_tab @ [Wir|Wiz|Win]
        ("whh",      EMBED_DIM,       3 * EMBED_DIM),   # [Whr|Whz|Whn]
        ("vw1",      VEC_DIM,         2 * EMBED_DIM),
        ("vw2",      2 * EMBED_DIM,   EMBED_DIM),
        ("w1_seq",   SEQ_VOCAB,       HIDDEN_DIMS[0]),  # seq_tab @ w1_seq
        ("w1_char",  EMBED_DIM,       HIDDEN_DIMS[0]),
        ("w1_vec",   EMBED_DIM,       HIDDEN_DIMS[0]),
        ("w1_sc",    SCALAR_DIM,      HIDDEN_DIMS[0]),
        ("w2",       HIDDEN_DIMS[0],  HIDDEN_DIMS[1]),
        ("w3",       HIDDEN_DIMS[1],  LANE_OUT),        # lane-padded to 128
        ("b_gi",     1,               3 * EMBED_DIM),   # [bir+bhr | biz+bhz | bin]
        ("b_hn",     1,               EMBED_DIM),       # bhn (stays inside r*(...))
        ("vb1",      1,               2 * EMBED_DIM),
        ("vb2",      1,               EMBED_DIM),
        ("cb1",      1,               HIDDEN_DIMS[0]),
        ("cb2",      1,               HIDDEN_DIMS[1]),
        ("cb3",      1,               LANE_OUT),        # lane-padded to 128
    ]
    layout, cur = {}, 0
    for name, r, c in spec:
        layout[name] = (cur, r, c)
        cur += ((r + 7) // 8) * 8        # every block starts 8-row aligned
    return layout, cur


W_LAYOUT, W_ROWS = _build_weight_layout()


# ----------------------------- fused forward kernel --------------------------
def fused_apk_kernel(ids_ref, data_ref, w_ref, out_ref):
    f32 = jnp.float32
    D = EMBED_DIM
    D3 = 3 * D
    S, T = SEQ_LEN, CHAR_LEN
    H1 = HIDDEN_DIMS[0]
    Bp = out_ref.shape[0]

    def wv(name):                                      # static sub-view of the slab
        off, r, c = W_LAYOUT[name]
        return w_ref[off:off + r, 0:c]

    # ---- sequence column: masked bag-of-tokens mean pooling -----------------
    sidx = ids_ref[0:S * Bp, :]                                        # (S*Bp, 1) time-major
    lane_s = jax.lax.broadcasted_iota(jnp.int32, (1, SEQ_VOCAB), 1)
    oh = jnp.logical_and(sidx == lane_s, sidx != PAD_IDX).astype(f32)  # (S*Bp, Vs)
    bag = oh[0:Bp, :]
    for t in range(1, S):                      # S-1 VPU adds; no pooling matmul
        bag = bag + oh[t * Bp:(t + 1) * Bp, :]
    counts = jnp.maximum(jnp.sum(bag, axis=1, keepdims=True), 1.0)     # (Bp, 1), exact
    # seq_tab @ w1_seq folded host-side; row-scaling commutes with right-mult:
    # (bag @ fused) / counts == (masked-mean embedding) @ w1_seq
    seq_h1 = jnp.dot(bag, wv("w1_seq"), preferred_element_type=f32) / counts

    # ---- char column: fused (embed x W_ih) table + fused-gate GRU -----------
    cidx = ids_ref[S * Bp:S * Bp + T * Bp, :]                          # (T*Bp, 1) time-major
    lane_c = jax.lax.broadcasted_iota(jnp.int32, (1, CHAR_VOCAB), 1)
    coh = (cidx == lane_c).astype(f32)                                 # (T*Bp, Vc)
    gi = jnp.dot(coh, wv("wih"), preferred_element_type=f32) + wv("b_gi")  # (T*Bp, 3D)

    whh = wv("whh")                                                    # (D, 3D)
    bhn = jnp.broadcast_to(wv("b_hn"), (Bp, D))                        # hoisted broadcast
    h = jnp.zeros((Bp, D), f32)
    for t in range(T):                         # static trip count -> unrolled
        lo = t * Bp                            # sublane-aligned row block
        gi_t = gi[lo:lo + Bp, :]
        hg = jnp.dot(h, whh, preferred_element_type=f32)   # ONE MXU push per step
        r = jax.nn.sigmoid(gi_t[:, 0:D] + hg[:, 0:D])
        z = jax.nn.sigmoid(gi_t[:, D:2 * D] + hg[:, D:2 * D])
        n = jnp.tanh(gi_t[:, 2 * D:D3] + r * (hg[:, 2 * D:D3] + bhn))
        h = (1.0 - z) * n + z * h                                      # (Bp, D)

    # ---- vector column: Linear + ReLU + Linear + ReLU ------------------------
    vec = data_ref[0:Bp, :]
    v1 = jnp.maximum(
        jnp.dot(vec, wv("vw1"), preferred_element_type=f32) + wv("vb1"), 0.0)
    vr = jnp.maximum(
        jnp.dot(v1, wv("vw2"), preferred_element_type=f32) + wv("vb2"), 0.0)

    # ---- classifier (concat-free; scalar cols as VPU broadcast-FMAs) --------
    # Dropout is identity in eval mode; Quant/DeQuant stubs are identity.
    sc = data_ref[Bp:2 * Bp, 0:SCALAR_DIM]                             # (Bp, 2)
    scw = wv("w1_sc")                                                  # (2, H1)
    sc_h1 = sc[:, 0:1] * scw[0:1, :]
    for j in range(1, SCALAR_DIM):
        sc_h1 = sc_h1 + sc[:, j:j + 1] * scw[j:j + 1, :]

    h1 = jnp.maximum(
        seq_h1
        + jnp.dot(h, wv("w1_char"), preferred_element_type=f32)
        + jnp.dot(vr, wv("w1_vec"), preferred_element_type=f32)
        + sc_h1 + wv("cb1"), 0.0)
    h2 = jnp.maximum(
        jnp.dot(h1, wv("w2"), preferred_element_type=f32) + wv("cb2"), 0.0)
    # lane-dense store: (Bp, 128); real logits live in lanes [0, N_CLASSES)
    out_ref[...] = jnp.dot(h2, wv("w3"), preferred_element_type=f32) + wv("cb3")


# ---------------------------- parameter init ---------------------------------
def init_params(key):
    ks = iter(jax.random.split(key, 32))

    def rnd(shape, scale=0.1):
        return (scale * jax.random.normal(next(ks), shape)).astype(jnp.float32)

    seq_table = rnd((SEQ_VOCAB, EMBED_DIM)).at[PAD_IDX].set(0.0)     # padding_idx row
    char_table = rnd((CHAR_VOCAB, CHAR_IN)).at[PAD_IDX].set(0.0)
    char = dict(
        table=char_table,
        wih_r=rnd((CHAR_IN, EMBED_DIM)), wih_z=rnd((CHAR_IN, EMBED_DIM)),
        wih_n=rnd((CHAR_IN, EMBED_DIM)),
        whh_r=rnd((EMBED_DIM, EMBED_DIM)), whh_z=rnd((EMBED_DIM, EMBED_DIM)),
        whh_n=rnd((EMBED_DIM, EMBED_DIM)),
        bih_r=rnd((1, EMBED_DIM)), bih_z=rnd((1, EMBED_DIM)), bih_n=rnd((1, EMBED_DIM)),
        bhh_r=rnd((1, EMBED_DIM)), bhh_z=rnd((1, EMBED_DIM)), bhh_n=rnd((1, EMBED_DIM)),
    )
    vec = dict(
        w1=rnd((VEC_DIM, 2 * EMBED_DIM)), b1=rnd((1, 2 * EMBED_DIM)),
        w2=rnd((2 * EMBED_DIM, EMBED_DIM)), b2=rnd((1, EMBED_DIM)),
    )
    H1, H2 = HIDDEN_DIMS
    clf = dict(
        w1_seq=rnd((EMBED_DIM, H1)), w1_char=rnd((EMBED_DIM, H1)),
        w1_vec=rnd((EMBED_DIM, H1)), w1_sc=rnd((SCALAR_DIM, H1)),
        b1=rnd((1, H1)), w2=rnd((H1, H2)), b2=rnd((1, H2)),
        w3=rnd((H2, N_CLASSES)), b3=rnd((1, N_CLASSES)),
    )
    return dict(seq_table={"api_calls": seq_table}, char={"package_name": char},
                vec={"tls_features": vec}, classifier=clf)


def pack_weights(params):
    """Fold/fuse weights host-side (done ONCE) and pack into the weight slab."""
    g = params["char"]["package_name"]
    v = params["vec"]["tls_features"]
    c = params["classifier"]
    seq_tab = params["seq_table"]["api_calls"]

    wih_cat = jnp.concatenate([g["wih_r"], g["wih_z"], g["wih_n"]], axis=1)
    wih_fused = g["table"] @ wih_cat                                   # (Vc, 3D)
    whh_fused = jnp.concatenate([g["whh_r"], g["whh_z"], g["whh_n"]], axis=1)
    gi_bias = jnp.concatenate(
        [g["bih_r"] + g["bhh_r"], g["bih_z"] + g["bhh_z"], g["bih_n"]], axis=1)
    w1_seq_fused = seq_tab @ c["w1_seq"]                               # (Vs, H1)
    w3p = jnp.zeros((HIDDEN_DIMS[1], LANE_OUT), jnp.float32).at[:, :N_CLASSES].set(c["w3"])
    b3p = jnp.zeros((1, LANE_OUT), jnp.float32).at[:, :N_CLASSES].set(c["b3"])

    entries = {
        "wih": wih_fused, "whh": whh_fused, "b_gi": gi_bias, "b_hn": g["bhh_n"],
        "vw1": v["w1"], "vb1": v["b1"], "vw2": v["w2"], "vb2": v["b2"],
        "w1_seq": w1_seq_fused, "w1_char": c["w1_char"], "w1_vec": c["w1_vec"],
        "w1_sc": c["w1_sc"], "cb1": c["b1"], "w2": c["w2"], "cb2": c["b2"],
        "w3": w3p, "cb3": b3p,
    }
    slab = jnp.zeros((W_ROWS, LANE_OUT), jnp.float32)
    for name, (off, r, cols) in W_LAYOUT.items():
        w = entries[name]
        assert w.shape == (r, cols), (name, w.shape, (r, cols))
        slab = slab.at[off:off + r, 0:cols].set(w.astype(jnp.float32))
    return slab


# ---------------------------- forward wrapper ---------------------------------
def apk_analysis_forward(weight_slab, seq_feats, char_feats, vector_feats, scalars):
    seq = seq_feats["api_calls"].astype(jnp.int32)
    char = char_feats["package_name"].astype(jnp.int32)
    vec = vector_feats["tls_features"].astype(jnp.float32)
    # NOTE: dict insertion order defines the scalar row layout of w1_sc,
    # exactly like the PyTorch module's `[scalars[col] for col in scalars]`.
    scal = jnp.concatenate([scalars[k] for k in scalars], axis=1).astype(jnp.float32)

    B = seq.shape[0]
    Bp = max(8, ((B + 7) // 8) * 8)        # pad batch to a sublane multiple

    def pad_rows(x):
        return jnp.pad(x, ((0, Bp - B),) + ((0, 0),) * (x.ndim - 1))

    # int32 id slab: [seq time-major flat ; char time-major flat], one column.
    seq_tm = pad_rows(seq).T.reshape(SEQ_LEN * Bp, 1)
    char_tm = pad_rows(char).T.reshape(CHAR_LEN * Bp, 1)
    ids = jnp.concatenate([seq_tm, char_tm], axis=0)                   # (S*Bp+T*Bp, 1)

    # f32 data slab: rows [0:Bp] = vec, rows [Bp:2Bp, :SCALAR_DIM] = scalars.
    data = jnp.zeros((2 * Bp, VEC_DIM), jnp.float32)
    data = data.at[0:Bp, :].set(pad_rows(vec))
    data = data.at[Bp:2 * Bp, 0:SCALAR_DIM].set(pad_rows(scal))

    D, D3 = EMBED_DIM, 3 * EMBED_DIM
    H1, H2 = HIDDEN_DIMS
    flops = 2 * (CHAR_LEN * Bp * CHAR_VOCAB * D3       # fused GRU input projection
                 + CHAR_LEN * Bp * D * D3              # GRU recurrence matmuls
                 + Bp * SEQ_VOCAB * H1                 # seq bag -> h1
                 + Bp * VEC_DIM * 2 * D + Bp * 2 * D * D
                 + 2 * Bp * D * H1 + Bp * H1 * H2 + Bp * H2 * LANE_OUT)
    cost = pl.CostEstimate(
        flops=flops,
        transcendentals=CHAR_LEN * Bp * 3 * D,
        bytes_accessed=4 * (weight_slab.size + ids.size + data.size + Bp * LANE_OUT))

    padded_logits = pl.pallas_call(
        fused_apk_kernel,
        out_shape=jax.ShapeDtypeStruct((Bp, LANE_OUT), jnp.float32),
        in_specs=[_VMEM, _VMEM, _VMEM],
        out_specs=_VMEM,
        cost_estimate=cost,
    )(ids, data, weight_slab)

    return padded_logits[:B, :N_CLASSES]


# ------------------------------------ main ------------------------------------
if __name__ == "__main__":
    key = jax.random.PRNGKey(0)
    kp, k1, k2, k3, k4, k5 = jax.random.split(key, 6)

    params = init_params(kp)
    weight_slab = pack_weights(params)     # host-side fold/fuse + pack (once)

    B = 2
    seq_feats = {
        "api_calls": jax.random.randint(k1, (B, SEQ_LEN), 0, SEQ_VOCAB,
                                        dtype=jnp.int32),
    }
    char_feats = {
        "package_name": jax.random.randint(k2, (B, CHAR_LEN), 0, CHAR_VOCAB,
                                           dtype=jnp.int32),
    }
    vector_feats = {
        "tls_features": jax.random.normal(k3, (B, VEC_DIM), jnp.float32),
    }
    scalars = {
        "file_size": jax.random.normal(k4, (B, 1), jnp.float32),
        "n_permissions": jax.random.normal(k5, (B, 1), jnp.float32),
    }

    fwd = jax.jit(apk_analysis_forward)
    logits = fwd(weight_slab, seq_feats, char_feats, vector_feats, scalars)
    jax.block_until_ready(logits)
    assert logits.shape == (B, N_CLASSES) and logits.dtype == jnp.float32
    assert bool(jnp.all(jnp.isfinite(logits)))
    print("KERNEL_OK")
</pallas_src>

<mosaic_0001>
module attributes {stable_mosaic.version = 11 : i64} {
  func.func @fused_apk_kernel(%arg0: memref<128x1xi32, #tpu.memory_space<vmem>>, %arg1: memref<16x64xf32, #tpu.memory_space<vmem>>, %arg2: memref<576x128xf32, #tpu.memory_space<vmem>>, %arg3: memref<8x128xf32, #tpu.memory_space<vmem>>) attributes {dimension_semantics = [], scalar_prefetch = 0 : i64, scratch_operands = 0 : i64, tpu.core_type = #tpu.core_type<tc>} {
    %c0 = arith.constant 0 : index
    %c0_0 = arith.constant 0 : index
    %0 = vector.load %arg0[%c0, %c0_0] : memref<128x1xi32, #tpu.memory_space<vmem>>, vector<64x1xi32>
    %1 = tpu.iota {dimensions = array<i32: 1>} : vector<1x64xi32>
    %2 = vector.broadcast %0 : vector<64x1xi32> to vector<64x64xi32>
    %3 = vector.broadcast %1 : vector<1x64xi32> to vector<64x64xi32>
    %4 = arith.cmpi eq, %2, %3 : vector<64x64xi32>
    %c0_i32 = arith.constant 0 : i32
    %5 = vector.broadcast %c0_i32 : i32 to vector<64x1xi32>
    %6 = arith.cmpi ne, %0, %5 : vector<64x1xi32>
    %7 = vector.broadcast %6 : vector<64x1xi1> to vector<64x64xi1>
    %8 = arith.andi %4, %7 : vector<64x64xi1>
    %9 = arith.extui %8 : vector<64x64xi1> to vector<64x64xi32>
    %10 = arith.sitofp %9 : vector<64x64xi32> to vector<64x64xf32>
    %11 = vector.extract_strided_slice %10 {offsets = [0, 0], sizes = [8, 64], strides = [1, 1]} : vector<64x64xf32> to vector<8x64xf32>
    %12 = vector.extract_strided_slice %10 {offsets = [8, 0], sizes = [8, 64], strides = [1, 1]} : vector<64x64xf32> to vector<8x64xf32>
    %13 = arith.addf %11, %12 : vector<8x64xf32>
    %14 = vector.extract_strided_slice %10 {offsets = [16, 0], sizes = [8, 64], strides = [1, 1]} : vector<64x64xf32> to vector<8x64xf32>
    %15 = arith.addf %13, %14 : vector<8x64xf32>
    %16 = vector.extract_strided_slice %10 {offsets = [24, 0], sizes = [8, 64], strides = [1, 1]} : vector<64x64xf32> to vector<8x64xf32>
    %17 = arith.addf %15, %16 : vector<8x64xf32>
    %18 = vector.extract_strided_slice %10 {offsets = [32, 0], sizes = [8, 64], strides = [1, 1]} : vector<64x64xf32> to vector<8x64xf32>
    %19 = arith.addf %17, %18 : vector<8x64xf32>
    %20 = vector.extract_strided_slice %10 {offsets = [40, 0], sizes = [8, 64], strides = [1, 1]} : vector<64x64xf32> to vector<8x64xf32>
    %21 = arith.addf %19, %20 : vector<8x64xf32>
    %22 = vector.extract_strided_slice %10 {offsets = [48, 0], sizes = [8, 64], strides = [1, 1]} : vector<64x64xf32> to vector<8x64xf32>
    %23 = arith.addf %21, %22 : vector<8x64xf32>
    %24 = vector.extract_strided_slice %10 {offsets = [56, 0], sizes = [8, 64], strides = [1, 1]} : vector<64x64xf32> to vector<8x64xf32>
    %25 = arith.addf %23, %24 : vector<8x64xf32>
    %cst = arith.constant dense<0.000000e+00> : vector<8xf32>
    %26 = vector.multi_reduction <add>, %25, %cst [1] : vector<8x64xf32> to vector<8xf32>
    %27 = vector.shape_cast %26 : vector<8xf32> to vector<8x1xf32>
    %cst_1 = arith.constant 1.000000e+00 : f32
    %28 = vector.broadcast %cst_1 : f32 to vector<8x1xf32>
    %29 = arith.maximumf %27, %28 : vector<8x1xf32>
    %c192 = arith.constant 192 : index
    %c0_2 = arith.constant 0 : index
    %30 = vector.load %arg2[%c192, %c0_2] : memref<576x128xf32, #tpu.memory_space<vmem>>, vector<64x128xf32>
    %cst_3 = arith.constant dense<0.000000e+00> : vector<8x128xf32>
    %31 = tpu.matmul %25, %30, %cst_3 {dimension_numbers = #tpu.dot_dimension_numbers<[1], [0], [0], [1], [0, 0, 1, 1], [], []>} : vector<8x64xf32>, vector<64x128xf32>, vector<8x128xf32> -> vector<8x128xf32>
    %32 = vector.broadcast %29 : vector<8x1xf32> to vector<8x128xf32>
    %33 = arith.divf %31, %32 : vector<8x128xf32>
    %c64 = arith.constant 64 : index
    %c0_4 = arith.constant 0 : index
    %34 = vector.load %arg0[%c64, %c0_4] : memref<128x1xi32, #tpu.memory_space<vmem>>, vector<64x1xi32>
    %35 = tpu.iota {dimensions = array<i32: 1>} : vector<1x32xi32>
    %36 = vector.broadcast %34 : vector<64x1xi32> to vector<64x32xi32>
    %37 = vector.broadcast %35 : vector<1x32xi32> to vector<64x32xi32>
    %38 = arith.cmpi eq, %36, %37 : vector<64x32xi32>
    %39 = arith.extui %38 : vector<64x32xi1> to vector<64x32xi32>
    %40 = arith.sitofp %39 : vector<64x32xi32> to vector<64x32xf32>
    %c0_5 = arith.constant 0 : index
    %c0_6 = arith.constant 0 : index
    %41 = vector.load %arg2[%c0_5, %c0_6] : memref<576x128xf32, #tpu.memory_space<vmem>>, vector<32x96xf32>
    %cst_7 = arith.constant dense<0.000000e+00> : vector<64x96xf32>
    %42 = tpu.matmul %40, %41, %cst_7 {dimension_numbers = #tpu.dot_dimension_numbers<[1], [0], [0], [1], [0, 0, 1, 1], [], []>} : vector<64x32xf32>, vector<32x96xf32>, vector<64x96xf32> -> vector<64x96xf32>
    %c520 = arith.constant 520 : index
    %c0_8 = arith.constant 0 : index
    %43 = vector.load %arg2[%c520, %c0_8] : memref<576x128xf32, #tpu.memory_space<vmem>>, vector<1x96xf32>
    %44 = vector.broadcast %43 : vector<1x96xf32> to vector<64x96xf32>
    %45 = arith.addf %42, %44 : vector<64x96xf32>
    %c32 = arith.constant 32 : index
    %c0_9 = arith.constant 0 : index
    %46 = vector.load %arg2[%c32, %c0_9] : memref<576x128xf32, #tpu.memory_space<vmem>>, vector<32x96xf32>
    %c528 = arith.constant 528 : index
    %c0_10 = arith.constant 0 : index
    %47 = vector.load %arg2[%c528, %c0_10] : memref<576x128xf32, #tpu.memory_space<vmem>>, vector<1x32xf32>
    %48 = vector.shape_cast %47 : vector<1x32xf32> to vector<1x32xf32>
    %49 = vector.broadcast %48 : vector<1x32xf32> to vector<8x32xf32>
    %cst_11 = arith.constant 0.000000e+00 : f32
    %50 = vector.broadcast %cst_11 : f32 to vector<8x32xf32>
    %51 = vector.extract_strided_slice %45 {offsets = [0, 0], sizes = [8, 96], strides = [1, 1]} : vector<64x96xf32> to vector<8x96xf32>
    %cst_12 = arith.constant dense<0.000000e+00> : vector<8x96xf32>
    %52 = tpu.matmul %50, %46, %cst_12 {dimension_numbers = #tpu.dot_dimension_numbers<[1], [0], [0], [1], [0, 0, 1, 1], [], []>} : vector<8x32xf32>, vector<32x96xf32>, vector<8x96xf32> -> vector<8x96xf32>
    %53 = vector.extract_strided_slice %51 {offsets = [0, 0], sizes = [8, 32], strides = [1, 1]} : vector<8x96xf32> to vector<8x32xf32>
    %54 = vector.extract_strided_slice %52 {offsets = [0, 0], sizes = [8, 32], strides = [1, 1]} : vector<8x96xf32> to vector<8x32xf32>
    %55 = arith.addf %53, %54 : vector<8x32xf32>
    %56 = arith.negf %55 : vector<8x32xf32>
    %57 = math.exp %56 : vector<8x32xf32>
    %cst_13 = arith.constant 1.000000e+00 : f32
    %58 = vector.broadcast %cst_13 : f32 to vector<8x32xf32>
    %59 = arith.addf %58, %57 : vector<8x32xf32>
    %60 = arith.divf %58, %59 : vector<8x32xf32>
    %61 = vector.extract_strided_slice %51 {offsets = [0, 32], sizes = [8, 32], strides = [1, 1]} : vector<8x96xf32> to vector<8x32xf32>
    %62 = vector.extract_strided_slice %52 {offsets = [0, 32], sizes = [8, 32], strides = [1, 1]} : vector<8x96xf32> to vector<8x32xf32>
    %63 = arith.addf %61, %62 : vector<8x32xf32>
    %64 = arith.negf %63 : vector<8x32xf32>
    %65 = math.exp %64 : vector<8x32xf32>
    %cst_14 = arith.constant 1.000000e+00 : f32
    %66 = vector.broadcast %cst_14 : f32 to vector<8x32xf32>
    %67 = arith.addf %66, %65 : vector<8x32xf32>
    %68 = arith.divf %66, %67 : vector<8x32xf32>
    %69 = vector.extract_strided_slice %51 {offsets = [0, 64], sizes = [8, 32], strides = [1, 1]} : vector<8x96xf32> to vector<8x32xf32>
    %70 = vector.extract_strided_slice %52 {offsets = [0, 64], sizes = [8, 32], strides = [1, 1]} : vector<8x96xf32> to vector<8x32xf32>
    %71 = arith.addf %70, %49 : vector<8x32xf32>
    %72 = arith.mulf %60, %71 : vector<8x32xf32>
    %73 = arith.addf %69, %72 : vector<8x32xf32>
    %74 = math.tanh %73 : vector<8x32xf32>
    %cst_15 = arith.constant 1.000000e+00 : f32
    %75 = vector.broadcast %cst_15 : f32 to vector<8x32xf32>
    %76 = arith.subf %75, %68 : vector<8x32xf32>
    %77 = arith.mulf %76, %74 : vector<8x32xf32>
    %78 = arith.mulf %68, %50 : vector<8x32xf32>
    %79 = arith.addf %77, %78 : vector<8x32xf32>
    %80 = vector.extract_strided_slice %45 {offsets = [8, 0], sizes = [8, 96], strides = [1, 1]} : vector<64x96xf32> to vector<8x96xf32>
    %cst_16 = arith.constant dense<0.000000e+00> : vector<8x96xf32>
    %81 = tpu.matmul %79, %46, %cst_16 {dimension_numbers = #tpu.dot_dimension_numbers<[1], [0], [0], [1], [0, 0, 1, 1], [], []>} : vector<8x32xf32>, vector<32x96xf32>, vector<8x96xf32> -> vector<8x96xf32>
    %82 = vector.extract_strided_slice %80 {offsets = [0, 0], sizes = [8, 32], strides = [1, 1]} : vector<8x96xf32> to vector<8x32xf32>
    %83 = vector.extract_strided_slice %81 {offsets = [0, 0], sizes = [8, 32], strides = [1, 1]} : vector<8x96xf32> to vector<8x32xf32>
    %84 = arith.addf %82, %83 : vector<8x32xf32>
    %85 = arith.negf %84 : vector<8x32xf32>
    %86 = math.exp %85 : vector<8x32xf32>
    %cst_17 = arith.constant 1.000000e+00 : f32
    %87 = vector.broadcast %cst_17 : f32 to vector<8x32xf32>
    %88 = arith.addf %87, %86 : vector<8x32xf32>
    %89 = arith.divf %87, %88 : vector<8x32xf32>
    %90 = vector.extract_strided_slice %80 {offsets = [0, 32], sizes = [8, 32], strides = [1, 1]} : vector<8x96xf32> to vector<8x32xf32>
    %91 = vector.extract_strided_slice %81 {offsets = [0, 32], sizes = [8, 32], strides = [1, 1]} : vector<8x96xf32> to vector<8x32xf32>
    %92 = arith.addf %90, %91 : vector<8x32xf32>
    %93 = arith.negf %92 : vector<8x32xf32>
    %94 = math.exp %93 : vector<8x32xf32>
    %cst_18 = arith.constant 1.000000e+00 : f32
    %95 = vector.broadcast %cst_18 : f32 to vector<8x32xf32>
    %96 = arith.addf %95, %94 : vector<8x32xf32>
    %97 = arith.divf %95, %96 : vector<8x32xf32>
    %98 = vector.extract_strided_slice %80 {offsets = [0, 64], sizes = [8, 32], strides = [1, 1]} : vector<8x96xf32> to vector<8x32xf32>
    %99 = vector.extract_strided_slice %81 {offsets = [0, 64], sizes = [8, 32], strides = [1, 1]} : vector<8x96xf32> to vector<8x32xf32>
    %100 = arith.addf %99, %49 : vector<8x32xf32>
    %101 = arith.mulf %89, %100 : vector<8x32xf32>
    %102 = arith.addf %98, %101 : vector<8x32xf32>
    %103 = math.tanh %102 : vector<8x32xf32>
    %cst_19 = arith.constant 1.000000e+00 : f32
    %104 = vector.broadcast %cst_19 : f32 to vector<8x32xf32>
    %105 = arith.subf %104, %97 : vector<8x32xf32>
    %106 = arith.mulf %105, %103 : vector<8x32xf32>
    %107 = arith.mulf %97, %79 : vector<8x32xf32>
    %108 = arith.addf %106, %107 : vector<8x32xf32>
    %109 = vector.extract_strided_slice %45 {offsets = [16, 0], sizes = [8, 96], strides = [1, 1]} : vector<64x96xf32> to vector<8x96xf32>
    %cst_20 = arith.constant dense<0.000000e+00> : vector<8x96xf32>
    %110 = tpu.matmul %108, %46, %cst_20 {dimension_numbers = #tpu.dot_dimension_numbers<[1], [0], [0], [1], [0, 0, 1, 1], [], []>} : vector<8x32xf32>, vector<32x96xf32>, vector<8x96xf32> -> vector<8x96xf32>
    %111 = vector.extract_strided_slice %109 {offsets = [0, 0], sizes = [8, 32], strides = [1, 1]} : vector<8x96xf32> to vector<8x32xf32>
    %112 = vector.extract_strided_slice %110 {offsets = [0, 0], sizes = [8, 32], strides = [1, 1]} : vector<8x96xf32> to vector<8x32xf32>
    %113 = arith.addf %111, %112 : vector<8x32xf32>
    %114 = arith.negf %113 : vector<8x32xf32>
    %115 = math.exp %114 : vector<8x32xf32>
    %cst_21 = arith.constant 1.000000e+00 : f32
    %116 = vector.broadcast %cst_21 : f32 to vector<8x32xf32>
    %117 = arith.addf %116, %115 : vector<8x32xf32>
    %118 = arith.divf %116, %117 : vector<8x32xf32>
    %119 = vector.extract_strided_slice %109 {offsets = [0, 32], sizes = [8, 32], strides = [1, 1]} : vector<8x96xf32> to vector<8x32xf32>
    %120 = vector.extract_strided_slice %110 {offsets = [0, 32], sizes = [8, 32], strides = [1, 1]} : vector<8x96xf32> to vector<8x32xf32>
    %121 = arith.addf %119, %120 : vector<8x32xf32>
    %122 = arith.negf %121 : vector<8x32xf32>
    %123 = math.exp %122 : vector<8x32xf32>
    %cst_22 = arith.constant 1.000000e+00 : f32
    %124 = vector.broadcast %cst_22 : f32 to vector<8x32xf32>
    %125 = arith.addf %124, %123 : vector<8x32xf32>
    %126 = arith.divf %124, %125 : vector<8x32xf32>
    %127 = vector.extract_strided_slice %109 {offsets = [0, 64], sizes = [8, 32], strides = [1, 1]} : vector<8x96xf32> to vector<8x32xf32>
    %128 = vector.extract_strided_slice %110 {offsets = [0, 64], sizes = [8, 32], strides = [1, 1]} : vector<8x96xf32> to vector<8x32xf32>
    %129 = arith.addf %128, %49 : vector<8x32xf32>
    %130 = arith.mulf %118, %129 : vector<8x32xf32>
    %131 = arith.addf %127, %130 : vector<8x32xf32>
    %132 = math.tanh %131 : vector<8x32xf32>
    %cst_23 = arith.constant 1.000000e+00 : f32
    %133 = vector.broadcast %cst_23 : f32 to vector<8x32xf32>
    %134 = arith.subf %133, %126 : vector<8x32xf32>
    %135 = arith.mulf %134, %132 : vector<8x32xf32>
    %136 = arith.mulf %126, %108 : vector<8x32xf32>
    %137 = arith.addf %135, %136 : vector<8x32xf32>
    %138 = vector.extract_strided_slice %45 {offsets = [24, 0], sizes = [8, 96], strides = [1, 1]} : vector<64x96xf32> to vector<8x96xf32>
    %cst_24 = arith.constant dense<0.000000e+00> : vector<8x96xf32>
    %139 = tpu.matmul %137, %46, %cst_24 {dimension_numbers = #tpu.dot_dimension_numbers<[1], [0], [0], [1], [0, 0, 1, 1], [], []>} : vector<8x32xf32>, vector<32x96xf32>, vector<8x96xf32> -> vector<8x96xf32>
    %140 = vector.extract_strided_slice %138 {offsets = [0, 0], sizes = [8, 32], strides = [1, 1]} : vector<8x96xf32> to vector<8x32xf32>
    %141 = vector.extract_strided_slice %139 {offsets = [0, 0], sizes = [8, 32], strides = [1, 1]} : vector<8x96xf32> to vector<8x32xf32>
    %142 = arith.addf %140, %141 : vector<8x32xf32>
    %143 = arith.negf %142 : vector<8x32xf32>
    %144 = math.exp %143 : vector<8x32xf32>
    %cst_25 = arith.constant 1.000000e+00 : f32
    %145 = vector.broadcast %cst_25 : f32 to vector<8x32xf32>
    %146 = arith.addf %145, %144 : vector<8x32xf32>
    %147 = arith.divf %145, %146 : vector<8x32xf32>
    %148 = vector.extract_strided_slice %138 {offsets = [0, 32], sizes = [8, 32], strides = [1, 1]} : vector<8x96xf32> to vector<8x32xf32>
    %149 = vector.extract_strided_slice %139 {offsets = [0, 32], sizes = [8, 32], strides = [1, 1]} : vector<8x96xf32> to vector<8x32xf32>
    %150 = arith.addf %148, %149 : vector<8x32xf32>
    %151 = arith.negf %150 : vector<8x32xf32>
    %152 = math.exp %151 : vector<8x32xf32>
    %cst_26 = arith.constant 1.000000e+00 : f32
    %153 = vector.broadcast %cst_26 : f32 to vector<8x32xf32>
    %154 = arith.addf %153, %152 : vector<8x32xf32>
    %155 = arith.divf %153, %154 : vector<8x32xf32>
    %156 = vector.extract_strided_slice %138 {offsets = [0, 64], sizes = [8, 32], strides = [1, 1]} : vector<8x96xf32> to vector<8x32xf32>
    %157 = vector.extract_strided_slice %139 {offsets = [0, 64], sizes = [8, 32], strides = [1, 1]} : vector<8x96xf32> to vector<8x32xf32>
    %158 = arith.addf %157, %49 : vector<8x32xf32>
    %159 = arith.mulf %147, %158 : vector<8x32xf32>
    %160 = arith.addf %156, %159 : vector<8x32xf32>
    %161 = math.tanh %160 : vector<8x32xf32>
    %cst_27 = arith.constant 1.000000e+00 : f32
    %162 = vector.broadcast %cst_27 : f32 to vector<8x32xf32>
    %163 = arith.subf %162, %155 : vector<8x32xf32>
    %164 = arith.mulf %163, %161 : vector<8x32xf32>
    %165 = arith.mulf %155, %137 : vector<8x32xf32>
    %166 = arith.addf %164, %165 : vector<8x32xf32>
    %167 = vector.extract_strided_slice %45 {offsets = [32, 0], sizes = [8, 96], strides = [1, 1]} : vector<64x96xf32> to vector<8x96xf32>
    %cst_28 = arith.constant dense<0.000000e+00> : vector<8x96xf32>
    %168 = tpu.matmul %166, %46, %cst_28 {dimension_numbers = #tpu.dot_dimension_numbers<[1], [0], [0], [1], [0, 0, 1, 1], [], []>} : vector<8x32xf32>, vector<32x96xf32>, vector<8x96xf32> -> vector<8x96xf32>
    %169 = vector.extract_strided_slice %167 {offsets = [0, 0], sizes = [8, 32], strides = [1, 1]} : vector<8x96xf32> to vector<8x32xf32>
    %170 = vector.extract_strided_slice %168 {offsets = [0, 0], sizes = [8, 32], strides = [1, 1]} : vector<8x96xf32> to vector<8x32xf32>
    %171 = arith.addf %169, %170 : vector<8x32xf32>
    %172 = arith.negf %171 : vector<8x32xf32>
    %173 = math.exp %172 : vector<8x32xf32>
    %cst_29 = arith.constant 1.000000e+00 : f32
    %174 = vector.broadcast %cst_29 : f32 to vector<8x32xf32>
    %175 = arith.addf %174, %173 : vector<8x32xf32>
    %176 = arith.divf %174, %175 : vector<8x32xf32>
    %177 = vector.extract_strided_slice %167 {offsets = [0, 32], sizes = [8, 32], strides = [1, 1]} : vector<8x96xf32> to vector<8x32xf32>
    %178 = vector.extract_strided_slice %168 {offsets = [0, 32], sizes = [8, 32], strides = [1, 1]} : vector<8x96xf32> to vector<8x32xf32>
    %179 = arith.addf %177, %178 : vector<8x32xf32>
    %180 = arith.negf %179 : vector<8x32xf32>
    %181 = math.exp %180 : vector<8x32xf32>
    %cst_30 = arith.constant 1.000000e+00 : f32
    %182 = vector.broadcast %cst_30 : f32 to vector<8x32xf32>
    %183 = arith.addf %182, %181 : vector<8x32xf32>
    %184 = arith.divf %182, %183 : vector<8x32xf32>
    %185 = vector.extract_strided_slice %167 {offsets = [0, 64], sizes = [8, 32], strides = [1, 1]} : vector<8x96xf32> to vector<8x32xf32>
    %186 = vector.extract_strided_slice %168 {offsets = [0, 64], sizes = [8, 32], strides = [1, 1]} : vector<8x96xf32> to vector<8x32xf32>
    %187 = arith.addf %186, %49 : vector<8x32xf32>
    %188 = arith.mulf %176, %187 : vector<8x32xf32>
    %189 = arith.addf %185, %188 : vector<8x32xf32>
    %190 = math.tanh %189 : vector<8x32xf32>
    %cst_31 = arith.constant 1.000000e+00 : f32
    %191 = vector.broadcast %cst_31 : f32 to vector<8x32xf32>
    %192 = arith.subf %191, %184 : vector<8x32xf32>
    %193 = arith.mulf %192, %190 : vector<8x32xf32>
    %194 = arith.mulf %184, %166 : vector<8x32xf32>
    %195 = arith.addf %193, %194 : vector<8x32xf32>
    %196 = vector.extract_strided_slice %45 {offsets = [40, 0], sizes = [8, 96], strides = [1, 1]} : vector<64x96xf32> to vector<8x96xf32>
    %cst_32 = arith.constant dense<0.000000e+00> : vector<8x96xf32>
    %197 = tpu.matmul %195, %46, %cst_32 {dimension_numbers = #tpu.dot_dimension_numbers<[1], [0], [0], [1], [0, 0, 1, 1], [], []>} : vector<8x32xf32>, vector<32x96xf32>, vector<8x96xf32> -> vector<8x96xf32>
    %198 = vector.extract_strided_slice %196 {offsets = [0, 0], sizes = [8, 32], strides = [1, 1]} : vector<8x96xf32> to vector<8x32xf32>
    %199 = vector.extract_strided_slice %197 {offsets = [0, 0], sizes = [8, 32], strides = [1, 1]} : vector<8x96xf32> to vector<8x32xf32>
    %200 = arith.addf %198, %199 : vector<8x32xf32>
    %201 = arith.negf %200 : vector<8x32xf32>
    %202 = math.exp %201 : vector<8x32xf32>
    %cst_33 = arith.constant 1.000000e+00 : f32
    %203 = vector.broadcast %cst_33 : f32 to vector<8x32xf32>
    %204 = arith.addf %203, %202 : vector<8x32xf32>
    %205 = arith.divf %203, %204 : vector<8x32xf32>
    %206 = vector.extract_strided_slice %196 {offsets = [0, 32], sizes = [8, 32], strides = [1, 1]} : vector<8x96xf32> to vector<8x32xf32>
    %207 = vector.extract_strided_slice %197 {offsets = [0, 32], sizes = [8, 32], strides = [1, 1]} : vector<8x96xf32> to vector<8x32xf32>
    %208 = arith.addf %206, %207 : vector<8x32xf32>
    %209 = arith.negf %208 : vector<8x32xf32>
    %210 = math.exp %209 : vector<8x32xf32>
    %cst_34 = arith.constant 1.000000e+00 : f32
    %211 = vector.broadcast %cst_34 : f32 to vector<8x32xf32>
    %212 = arith.addf %211, %210 : vector<8x32xf32>
    %213 = arith.divf %211, %212 : vector<8x32xf32>
    %214 = vector.extract_strided_slice %196 {offsets = [0, 64], sizes = [8, 32], strides = [1, 1]} : vector<8x96xf32> to vector<8x32xf32>
    %215 = vector.extract_strided_slice %197 {offsets = [0, 64], sizes = [8, 32], strides = [1, 1]} : vector<8x96xf32> to vector<8x32xf32>
    %216 = arith.addf %215, %49 : vector<8x32xf32>
    %217 = arith.mulf %205, %216 : vector<8x32xf32>
    %218 = arith.addf %214, %217 : vector<8x32xf32>
    %219 = math.tanh %218 : vector<8x32xf32>
    %cst_35 = arith.constant 1.000000e+00 : f32
    %220 = vector.broadcast %cst_35 : f32 to vector<8x32xf32>
    %221 = arith.subf %220, %213 : vector<8x32xf32>
    %222 = arith.mulf %221, %219 : vector<8x32xf32>
    %223 = arith.mulf %213, %195 : vector<8x32xf32>
    %224 = arith.addf %222, %223 : vector<8x32xf32>
    %225 = vector.extract_strided_slice %45 {offsets = [48, 0], sizes = [8, 96], strides = [1, 1]} : vector<64x96xf32> to vector<8x96xf32>
    %cst_36 = arith.constant dense<0.000000e+00> : vector<8x96xf32>
    %226 = tpu.matmul %224, %46, %cst_36 {dimension_numbers = #tpu.dot_dimension_numbers<[1], [0], [0], [1], [0, 0, 1, 1], [], []>} : vector<8x32xf32>, vector<32x96xf32>, vector<8x96xf32> -> vector<8x96xf32>
    %227 = vector.extract_strided_slice %225 {offsets = [0, 0], sizes = [8, 32], strides = [1, 1]} : vector<8x96xf32> to vector<8x32xf32>
    %228 = vector.extract_strided_slice %226 {offsets = [0, 0], sizes = [8, 32], strides = [1, 1]} : vector<8x96xf32> to vector<8x32xf32>
    %229 = arith.addf %227, %228 : vector<8x32xf32>
    %230 = arith.negf %229 : vector<8x32xf32>
    %231 = math.exp %230 : vector<8x32xf32>
    %cst_37 = arith.constant 1.000000e+00 : f32
    %232 = vector.broadcast %cst_37 : f32 to vector<8x32xf32>
    %233 = arith.addf %232, %231 : vector<8x32xf32>
    %234 = arith.divf %232, %233 : vector<8x32xf32>
    %235 = vector.extract_strided_slice %225 {offsets = [0, 32], sizes = [8, 32], strides = [1, 1]} : vector<8x96xf32> to vector<8x32xf32>
    %236 = vector.extract_strided_slice %226 {offsets = [0, 32], sizes = [8, 32], strides = [1, 1]} : vector<8x96xf32> to vector<8x32xf32>
    %237 = arith.addf %235, %236 : vector<8x32xf32>
    %238 = arith.negf %237 : vector<8x32xf32>
    %239 = math.exp %238 : vector<8x32xf32>
    %cst_38 = arith.constant 1.000000e+00 : f32
    %240 = vector.broadcast %cst_38 : f32 to vector<8x32xf32>
    %241 = arith.addf %240, %239 : vector<8x32xf32>
    %242 = arith.divf %240, %241 : vector<8x32xf32>
    %243 = vector.extract_strided_slice %225 {offsets = [0, 64], sizes = [8, 32], strides = [1, 1]} : vector<8x96xf32> to vector<8x32xf32>
    %244 = vector.extract_strided_slice %226 {offsets = [0, 64], sizes = [8, 32], strides = [1, 1]} : vector<8x96xf32> to vector<8x32xf32>
    %245 = arith.addf %244, %49 : vector<8x32xf32>
    %246 = arith.mulf %234, %245 : vector<8x32xf32>
    %247 = arith.addf %243, %246 : vector<8x32xf32>
    %248 = math.tanh %247 : vector<8x32xf32>
    %cst_39 = arith.constant 1.000000e+00 : f32
    %249 = vector.broadcast %cst_39 : f32 to vector<8x32xf32>
    %250 = arith.subf %249, %242 : vector<8x32xf32>
    %251 = arith.mulf %250, %248 : vector<8x32xf32>
    %252 = arith.mulf %242, %224 : vector<8x32xf32>
    %253 = arith.addf %251, %252 : vector<8x32xf32>
    %254 = vector.extract_strided_slice %45 {offsets = [56, 0], sizes = [8, 96], strides = [1, 1]} : vector<64x96xf32> to vector<8x96xf32>
    %cst_40 = arith.constant dense<0.000000e+00> : vector<8x96xf32>
    %255 = tpu.matmul %253, %46, %cst_40 {dimension_numbers = #tpu.dot_dimension_numbers<[1], [0], [0], [1], [0, 0, 1, 1], [], []>} : vector<8x32xf32>, vector<32x96xf32>, vector<8x96xf32> -> vector<8x96xf32>
    %256 = vector.extract_strided_slice %254 {offsets = [0, 0], sizes = [8, 32], strides = [1, 1]} : vector<8x96xf32> to vector<8x32xf32>
    %257 = vector.extract_strided_slice %255 {offsets = [0, 0], sizes = [8, 32], strides = [1, 1]} : vector<8x96xf32> to vector<8x32xf32>
    %258 = arith.addf %256, %257 : vector<8x32xf32>
    %259 = arith.negf %258 : vector<8x32xf32>
    %260 = math.exp %259 : vector<8x32xf32>
    %cst_41 = arith.constant 1.000000e+00 : f32
    %261 = vector.broadcast %cst_41 : f32 to vector<8x32xf32>
    %262 = arith.addf %261, %260 : vector<8x32xf32>
    %263 = arith.divf %261, %262 : vector<8x32xf32>
    %264 = vector.extract_strided_slice %254 {offsets = [0, 32], sizes = [8, 32], strides = [1, 1]} : vector<8x96xf32> to vector<8x32xf32>
    %265 = vector.extract_strided_slice %255 {offsets = [0, 32], sizes = [8, 32], strides = [1, 1]} : vector<8x96xf32> to vector<8x32xf32>
    %266 = arith.addf %264, %265 : vector<8x32xf32>
    %267 = arith.negf %266 : vector<8x32xf32>
    %268 = math.exp %267 : vector<8x32xf32>
    %cst_42 = arith.constant 1.000000e+00 : f32
    %269 = vector.broadcast %cst_42 : f32 to vector<8x32xf32>
    %270 = arith.addf %269, %268 : vector<8x32xf32>
    %271 = arith.divf %269, %270 : vector<8x32xf32>
    %272 = vector.extract_strided_slice %254 {offsets = [0, 64], sizes = [8, 32], strides = [1, 1]} : vector<8x96xf32> to vector<8x32xf32>
    %273 = vector.extract_strided_slice %255 {offsets = [0, 64], sizes = [8, 32], strides = [1, 1]} : vector<8x96xf32> to vector<8x32xf32>
    %274 = arith.addf %273, %49 : vector<8x32xf32>
    %275 = arith.mulf %263, %274 : vector<8x32xf32>
    %276 = arith.addf %272, %275 : vector<8x32xf32>
    %277 = math.tanh %276 : vector<8x32xf32>
    %cst_43 = arith.constant 1.000000e+00 : f32
    %278 = vector.broadcast %cst_43 : f32 to vector<8x32xf32>
    %279 = arith.subf %278, %271 : vector<8x32xf32>
    %280 = arith.mulf %279, %277 : vector<8x32xf32>
    %281 = arith.mulf %271, %253 : vector<8x32xf32>
    %282 = arith.addf %280, %281 : vector<8x32xf32>
    %c0_44 = arith.constant 0 : index
    %c0_45 = arith.constant 0 : index
    %283 = vector.load %arg1[%c0_44, %c0_45] : memref<16x64xf32, #tpu.memory_space<vmem>>, vector<8x64xf32>
    %c64_46 = arith.constant 64 : index
    %c0_47 = arith.constant 0 : index
    %284 = vector.load %arg2[%c64_46, %c0_47] : memref<576x128xf32, #tpu.memory_space<vmem>>, vector<64x64xf32>
    %cst_48 = arith.constant dense<0.000000e+00> : vector<8x64xf32>
    %285 = tpu.matmul %283, %284, %cst_48 {dimension_numbers = #tpu.dot_dimension_numbers<[1], [0], [0], [1], [0, 0, 1, 1], [], []>} : vector<8x64xf32>, vector<64x64xf32>, vector<8x64xf32> -> vector<8x64xf32>
    %c536 = arith.constant 536 : index
    %c0_49 = arith.constant 0 : index
    %286 = vector.load %arg2[%c536, %c0_49] : memref<576x128xf32, #tpu.memory_space<vmem>>, vector<1x64xf32>
    %287 = vector.broadcast %286 : vector<1x64xf32> to vector<8x64xf32>
    %288 = arith.addf %285, %287 : vector<8x64xf32>
    %cst_50 = arith.constant 0.000000e+00 : f32
    %289 = vector.broadcast %cst_50 : f32 to vector<8x64xf32>
    %290 = arith.maximumf %288, %289 : vector<8x64xf32>
    %c128 = arith.constant 128 : index
    %c0_51 = arith.constant 0 : index
    %291 = vector.load %arg2[%c128, %c0_51] : memref<576x128xf32, #tpu.memory_space<vmem>>, vector<64x32xf32>
    %cst_52 = arith.constant dense<0.000000e+00> : vector<8x32xf32>
    %292 = tpu.matmul %290, %291, %cst_52 {dimension_numbers = #tpu.dot_dimension_numbers<[1], [0], [0], [1], [0, 0, 1, 1], [], []>} : vector<8x64xf32>, vector<64x32xf32>, vector<8x32xf32> -> vector<8x32xf32>
    %c544 = arith.constant 544 : index
    %c0_53 = arith.constant 0 : index
    %293 = vector.load %arg2[%c544, %c0_53] : memref<576x128xf32, #tpu.memory_space<vmem>>, vector<1x32xf32>
    %294 = vector.broadcast %293 : vector<1x32xf32> to vector<8x32xf32>
    %295 = arith.addf %292, %294 : vector<8x32xf32>
    %cst_54 = arith.constant 0.000000e+00 : f32
    %296 = vector.broadcast %cst_54 : f32 to vector<8x32xf32>
    %297 = arith.maximumf %295, %296 : vector<8x32xf32>
    %c8 = arith.constant 8 : index
    %c0_55 = arith.constant 0 : index
    %298 = vector.load %arg1[%c8, %c0_55] : memref<16x64xf32, #tpu.memory_space<vmem>>, vector<8x2xf32>
    %c320 = arith.constant 320 : index
    %c0_56 = arith.constant 0 : index
    %299 = vector.load %arg2[%c320, %c0_56] : memref<576x128xf32, #tpu.memory_space<vmem>>, vector<2x128xf32>
    %300 = vector.extract_strided_slice %298 {offsets = [0, 0], sizes = [8, 1], strides = [1, 1]} : vector<8x2xf32> to vector<8x1xf32>
    %301 = vector.extract_strided_slice %299 {offsets = [0, 0], sizes = [1, 128], strides = [1, 1]} : vector<2x128xf32> to vector<1x128xf32>
    %302 = vector.broadcast %300 : vector<8x1xf32> to vector<8x128xf32>
    %303 = vector.broadcast %301 : vector<1x128xf32> to vector<8x128xf32>
    %304 = arith.mulf %302, %303 : vector<8x128xf32>
    %305 = vector.extract_strided_slice %298 {offsets = [0, 1], sizes = [8, 1], strides = [1, 1]} : vector<8x2xf32> to vector<8x1xf32>
    %306 = vector.extract_strided_slice %299 {offsets = [1, 0], sizes = [1, 128], strides = [1, 1]} : vector<2x128xf32> to vector<1x128xf32>
    %307 = vector.broadcast %305 : vector<8x1xf32> to vector<8x128xf32>
    %308 = vector.broadcast %306 : vector<1x128xf32> to vector<8x128xf32>
    %309 = arith.mulf %307, %308 : vector<8x128xf32>
    %310 = arith.addf %304, %309 : vector<8x128xf32>
    %c256 = arith.constant 256 : index
    %c0_57 = arith.constant 0 : index
    %311 = vector.load %arg2[%c256, %c0_57] : memref<576x128xf32, #tpu.memory_space<vmem>>, vector<32x128xf32>
    %cst_58 = arith.constant dense<0.000000e+00> : vector<8x128xf32>
    %312 = tpu.matmul %282, %311, %cst_58 {dimension_numbers = #tpu.dot_dimension_numbers<[1], [0], [0], [1], [0, 0, 1, 1], [], []>} : vector<8x32xf32>, vector<32x128xf32>, vector<8x128xf32> -> vector<8x128xf32>
    %313 = arith.addf %33, %312 : vector<8x128xf32>
    %c288 = arith.constant 288 : index
    %c0_59 = arith.constant 0 : index
    %314 = vector.load %arg2[%c288, %c0_59] : memref<576x128xf32, #tpu.memory_space<vmem>>, vector<32x128xf32>
    %cst_60 = arith.constant dense<0.000000e+00> : vector<8x128xf32>
    %315 = tpu.matmul %297, %314, %cst_60 {dimension_numbers = #tpu.dot_dimension_numbers<[1], [0], [0], [1], [0, 0, 1, 1], [], []>} : vector<8x32xf32>, vector<32x128xf32>, vector<8x128xf32> -> vector<8x128xf32>
    %316 = arith.addf %313, %315 : vector<8x128xf32>
    %317 = arith.addf %316, %310 : vector<8x128xf32>
    %c552 = arith.constant 552 : index
    %c0_61 = arith.constant 0 : index
    %318 = vector.load %arg2[%c552, %c0_61] : memref<576x128xf32, #tpu.memory_space<vmem>>, vector<1x128xf32>
    %319 = vector.broadcast %318 : vector<1x128xf32> to vector<8x128xf32>
    %320 = arith.addf %317, %319 : vector<8x128xf32>
    %cst_62 = arith.constant 0.000000e+00 : f32
    %321 = vector.broadcast %cst_62 : f32 to vector<8x128xf32>
    %322 = arith.maximumf %320, %321 : vector<8x128xf32>
    %c328 = arith.constant 328 : index
    %c0_63 = arith.constant 0 : index
    %323 = vector.load %arg2[%c328, %c0_63] : memref<576x128xf32, #tpu.memory_space<vmem>>, vector<128x64xf32>
    %cst_64 = arith.constant dense<0.000000e+00> : vector<8x64xf32>
    %324 = tpu.matmul %322, %323, %cst_64 {dimension_numbers = #tpu.dot_dimension_numbers<[1], [0], [0], [1], [0, 0, 1, 1], [], []>} : vector<8x128xf32>, vector<128x64xf32>, vector<8x64xf32> -> vector<8x64xf32>
    %c560 = arith.constant 560 : index
    %c0_65 = arith.constant 0 : index
    %325 = vector.load %arg2[%c560, %c0_65] : memref<576x128xf32, #tpu.memory_space<vmem>>, vector<1x64xf32>
    %326 = vector.broadcast %325 : vector<1x64xf32> to vector<8x64xf32>
    %327 = arith.addf %324, %326 : vector<8x64xf32>
    %cst_66 = arith.constant 0.000000e+00 : f32
    %328 = vector.broadcast %cst_66 : f32 to vector<8x64xf32>
    %329 = arith.maximumf %327, %328 : vector<8x64xf32>
    %c456 = arith.constant 456 : index
    %c0_67 = arith.constant 0 : index
    %330 = vector.load %arg2[%c456, %c0_67] : memref<576x128xf32, #tpu.memory_space<vmem>>, vector<64x128xf32>
    %cst_68 = arith.constant dense<0.000000e+00> : vector<8x128xf32>
    %331 = tpu.matmul %329, %330, %cst_68 {dimension_numbers = #tpu.dot_dimension_numbers<[1], [0], [0], [1], [0, 0, 1, 1], [], []>} : vector<8x64xf32>, vector<64x128xf32>, vector<8x128xf32> -> vector<8x128xf32>
    %c568 = arith.constant 568 : index
    %c0_69 = arith.constant 0 : index
    %332 = vector.load %arg2[%c568, %c0_69] : memref<576x128xf32, #tpu.memory_space<vmem>>, vector<1x128xf32>
    %333 = vector.broadcast %332 : vector<1x128xf32> to vector<8x128xf32>
    %334 = arith.addf %331, %333 : vector<8x128xf32>
    %c0_70 = arith.constant 0 : index
    %c0_71 = arith.constant 0 : index
    %335 = vector.load %arg3[%c0_70, %c0_71] : memref<8x128xf32, #tpu.memory_space<vmem>>, vector<8x128xf32>
    tpu.vector_store %arg3[%c0_70, %c0_71], %334 {strides = array<i32>} : memref<8x128xf32, #tpu.memory_space<vmem>>, vector<8x128xf32>,
    return
  }
}

</mosaic_0001>

<bundles_post_ra>
// kernel: apk_analysis_forward.1
= control target key start
LH: loop header
LB: loop body
LE: loop exit
PB: predicated region body
PF: predicated region fallthrough
CT: control target
= control target key end

     0   :  { %8 = vsyncpa [#allocation3], 0  ;;  %s2298_s12 = smov [#allocation2]   ;;  %s2714_s0 = inlined_call_operand.vmem [shape: s32[128,1], index: 0, kind: input, shape index: {}]   ;;  %s2715_s1 = inlined_call_operand.vmem [shape: f32[16,64], index: 1, kind: input, shape index: {}]   ;;  %s2716_s2 = inlined_call_operand.hbm [shape: f32[576,128], index: 2, kind: input, shape index: {}]   ;;  %s2717_s3 = inlined_call_operand.vmem [shape: f32[8,128], index: 3, kind: output, shape index: {}]  }
   0x1   :  { %s18_s13 = sshll.u32 %s2298_s12, 4  ;;  %s19_s13 = int_to_ptr.vmem [resolvable:$true] %s18_s13 }
   0x2   :  { %s2284_s14 = scalar_lea.vmem %s19_s13, 9216  ;;  %p2289_p1 = scmp.lt.s32.totalorder %s19_s13, %s19_s13 }
   0x3   :  { %p2285_p0 = scmp.ne.s32.totalorder %s19_s13, %s2284_s14  ;;  %p2290_p2 = scmp.lt.s32.totalorder %s2284_s14, %s2284_s14 }
   0x5   :  { %p2291_p3 = por %p2290_p2, %p2289_p1 }
   0x7   :  { %p2292_p4 = pnand %p2291_p3, %p2285_p0 }
   0x9   :  { %2295 = shalt.err (!%p2292_p4)
}
   0xa   :  { %s2299_s15 = smov 128   ;;  %s2300_s16 = smov 8  }
   0xb   :  { %24 = dma.hbm_to_vmem [thread:$0]  %s2716_s2, 9216, %s19_s13, [#allocation3], %s2299_s15, %s2299_s15, %s2300_s16  }
   0xc   :  { %2296 = dma.done.wait [#allocation3], 9216  }
   0xd   :  { %2297 = vsyncadd [#allocation3], 4294958080  ;;  %v2301_v0 = vmov 0   ;;  %v2302_v1 = vmov 0.0   ;;  %v239_v2 = vld [vmem:[%s2714_s0 + $0x50] sm:$0xff]  ;;  %v237_v3 = vld [vmem:[%s2714_s0 + $0x40] sm:$0xff]  ;;  %v36_v15 = vlaneseq }
   0xe   :  { %2224 = vset.pattern.permute.xlu1 %v2301_v0  ;;  %2223 = vset.pattern.permute.xlu0 %v2301_v0  ;;  %v240_v4 = vld [vmem:[%s2714_s0 + $0x58] sm:$0xff]  ;;  %v238_v5 = vld [vmem:[%s2714_s0 + $0x48] sm:$0xff]  ;;  %v295_v7 = vld [vmem:[#allocation2 + $0x10] sm:$0xff]  ;;  %vm2303_vm0 = vmmov 0   ;;  %s2304_s7 = smov 64   ;;  %vm302_vm1 = vcmask 261120  }
   0xf   :  { %1973 = vmatprep.subr.mxu0 %v2302_v1  ;;  %252 = vperm.xlu1 %2224, %v239_v2   ;;  %v296_v6 = vld [vmem:[#allocation2 + $0x18] sm:$0xff]  ;;  %v294_v8 = vld [vmem:[#allocation2 + $0x8] sm:$0xff]  ;;  %v241_v10 = vld [vmem:[%s2714_s0 + $0x60] sm:$0xff]  ;;  %v2362_v16 = vand.u32 127, %v36_v15  ;;  %s2305_s8 = smov 96  }
  0x10   :  { %246 = vperm.xlu0 %2223, %v237_v3   ;;  %1992 = vmatprep.subr.mxu1 %v296_v6  ;;  %v242_v9 = vld [vmem:[%s2714_s0 + $0x68] sm:$0xff]  ;;  %v293_v11 = vld [vmem:[#allocation2] sm:$0xff]  ;;  %v244_v12 = vld [vmem:[%s2714_s0 + $0x78] sm:$0xff] }
  0x11   :  { %1993 = vmatpush3.msra.mxu1 %v296_v6  ;;  %v243_v13 = vld [vmem:[%s2714_s0 + $0x70] sm:$0xff]  ;;  %1989 = vmatprep.mubr.msk.f32.mxu0 %vm2303_vm0, %v2302_v1  ;;  %v2370_v23 = vld [vmem:[#allocation2 + $0x38] sm:$0xff]  ;;  %v2381_v28 = vld [vmem:[#allocation2 + $0x28] sm:$0xff] }
  0x12   :  { %1994 = vmatprep.subr.mxu1 %v295_v7  ;;  %v1832_v14 = vld [vmem:[#allocation2 + $0x210] ss:$0 sm:$0xff]  ;;  %v2389_v31 = vld [vmem:[#allocation2 + $0x20] sm:$0xff]  ;;  %v1823_v37 = vld [vmem:[#allocation2 + $0x208] ss:$0 sm:$0xff] }
  0x13   :  { %255 = vperm.xlu1 %2224, %v240_v4   ;;  %1995 = vmatpush3.msra.mxu1 %v295_v7  ;;  %v2375_v25 = vld [vmem:[#allocation2 + $0x30] sm:$0xff] }
  0x14   :  { %249 = vperm.xlu0 %2223, %v238_v5   ;;  %1996 = vmatprep.subr.mxu1 %v294_v8 }
  0x15   :  { %1997 = vmatpush3.msra.mxu1 %v294_v8 }
  0x16   :  { %1998 = vmatprep.subr.mxu1 %v293_v11 }
  0x17   :  { %261 = vperm.xlu1 %2224, %v242_v9   ;;  %1999 = vmatpush3.msra.mxu1 %v293_v11 }
  0x18   :  { %258 = vperm.xlu0 %2223, %v241_v10   ;;  %2012 = vmatprep.subr.mxu1 %v2302_v1 }
  0x1b   :  { %267 = vperm.xlu1 %2224, %v244_v12  }
  0x1c   :  { %264 = vperm.xlu0 %2223, %v243_v13  }
  0x20   :  { %522 = vrot.lane.b32.xlu0 %v1832_v14, %s2304_s7 }
  0x8a   :  { %v253_v17 = vpop.permute.xlu1 %252 }
  0x8b   :  { %v247_v18 = vpop.permute.xlu0 %246  ;;  %vm271_vm3 = vcmp.eq.s32.totalorder %v253_v17, %v2362_v16 }
  0x8c   :  { %vm269_vm2 = vcmp.eq.s32.totalorder %v247_v18, %v2362_v16  ;;  %v1817_v22 = vsel %vm271_vm3, 1.0, %v2302_v1 }
  0x8d   :  { %v1815_v19 = vsel %vm269_vm2, 1.0, %v2302_v1 }
  0x8e   :  { %2000 = vmatprep.mubr.msk.f32.mxu1 %vm302_vm1, %v1815_v19  ;;  %v256_v20 = vpop.permute.xlu1 %255 }
  0x8f   :  { %v250_v21 = vpop.permute.xlu0 %249  ;;  %vm272_vm5 = vcmp.eq.s32.totalorder %v256_v20, %v2362_v16 }
  0x90   :  { %vm270_vm4 = vcmp.eq.s32.totalorder %v250_v21, %v2362_v16  ;;  %v1818_v29 = vsel %vm272_vm5, 1.0, %v2302_v1 }
  0x91   :  { %v1816_v24 = vsel %vm270_vm4, 1.0, %v2302_v1 }
  0x92   :  { %2001 = vmatmul.mubr.msk.f32.vlgmr.msra.gmra.mxu1 %vm302_vm1, %v1816_v24  ;;  %v262_v26 = vpop.permute.xlu1 %261 }
  0x93   :  { %2013 = vmatpush3.msra.mxu1 %v2370_v23  ;;  %2003 = vmatprep.mubr.msk.f32.mxu1 %vm302_vm1, %v1817_v22  ;;  %v259_v27 = vpop.permute.xlu0 %258  ;;  %vm274_vm7 = vcmp.eq.s32.totalorder %v262_v26, %v2362_v16  ;;  %v28_v26 = vld [vmem:[%s2714_s0] sm:$0xff] }
  0x94   :  { %vm273_vm6 = vcmp.eq.s32.totalorder %v259_v27, %v2362_v16  ;;  %2014 = vmatprep.subr.mxu1 %v2302_v1  ;;  %v1820_v34 = vsel %vm274_vm7, 1.0, %v2302_v1  ;;  %vm70_vm10 = vcmp.ne.s32.totalorder %v28_v26, 0 }
  0x95   :  { %v1819_v30 = vsel %vm273_vm6, 1.0, %v2302_v1  ;;  %2015 = vmatpush3.msra.mxu1 %v2375_v25  ;;  %v78_v27 = vsel %vm70_vm10, 1, %v2301_v0 }
  0x96   :  { %2004 = vmatmul.mubr.msk.f32.gmra.mxu1 %vm302_vm1, %v1818_v29  ;;  %2016 = vmatprep.subr.mxu1 %v2302_v1  ;;  %v268_v32 = vpop.permute.xlu1 %267  ;;  %v30_v29 = vld [vmem:[%s2714_s0 + $0x10] sm:$0xff] }
  0x97   :  { %2006 = vmatprep.mubr.msk.f32.mxu1 %vm302_vm1, %v1819_v30  ;;  %v265_v33 = vpop.permute.xlu0 %264  ;;  %2017 = vmatpush3.msra.mxu1 %v2381_v28  ;;  %vm276_vm9 = vcmp.eq.s32.totalorder %v268_v32, %v2362_v16  ;;  %v31_v30 = vld [vmem:[%s2714_s0 + $0x18] sm:$0xff]  ;;  %v32_v32 = vld [vmem:[%s2714_s0 + $0x20] sm:$0xff]  ;;  %vm72_vm12 = vcmp.ne.s32.totalorder %v30_v29, 0 }
  0x98   :  { %vm275_vm8 = vcmp.eq.s32.totalorder %v265_v33, %v2362_v16  ;;  %2018 = vmatprep.subr.mxu1 %v2302_v1  ;;  %v1822_v36 = vsel %vm276_vm9, 1.0, %v2302_v1  ;;  %v33_v33 = vld [vmem:[%s2714_s0 + $0x28] sm:$0xff]  ;;  %vm73_vm13 = vcmp.ne.s32.totalorder %v31_v30, 0  ;;  %vm74_vm14 = vcmp.ne.s32.totalorder %v32_v32, 0 }
  0x99   :  { %v1821_v35 = vsel %vm275_vm8, 1.0, %v2302_v1  ;;  %2019 = vmatpush3.msra.mxu1 %v2389_v31  ;;  %vm75_vm15 = vcmp.ne.s32.totalorder %v33_v33, 0 }
  0x9a   :  { %2007 = vmatmul.mubr.msk.f32.gmra.mxu1 %vm302_vm1, %v1820_v34  ;;  %2023 = vmatprep.subr.mxu1 %v2302_v1  ;;  %v34_v34 = vld [vmem:[%s2714_s0 + $0x30] sm:$0xff] }
  0x9b   :  { %2009 = vmatprep.mubr.msk.f32.mxu1 %vm302_vm1, %v1821_v35  ;;  %v2429_v52 = vpop.permute.xlu0 %522  ;;  %v35_v35 = vld [vmem:[%s2714_s0 + $0x38] sm:$0xff]  ;;  %vm76_vm2 = vcmp.ne.s32.totalorder %v34_v34, 0 }
  0x9c   :  { %vm77_vm3 = vcmp.ne.s32.totalorder %v35_v35, 0 }
  0x9e   :  { %2010 = vmatmul.mubr.msk.f32.gmra.mxu1 %vm302_vm1, %v1822_v36 }
  0x9f   :  { %2020 = vmatprep.mubr.msk.f32.mxu1 %vm2303_vm0, %v2302_v1 }
  0xa2   :  { %2021 = vmatmul.mubr.f32.vlgmr.msra.gmra.mxu1 %v2302_v1 }
  0xa3   :  { %2024 = vmatpush3.msra.mxu1 %v2370_v23  ;;  %2031 = vmatprep.mubr.msk.f32.mxu1 %vm2303_vm0, %v2302_v1 }
  0xa4   :  { %2025 = vmatprep.subr.mxu1 %v2302_v1 }
  0xa5   :  { %2026 = vmatpush3.msra.mxu1 %v2375_v25 }
  0xa6   :  { %2027 = vmatprep.subr.mxu1 %v2302_v1 }
  0xa7   :  { %2028 = vmatpush3.msra.mxu1 %v2381_v28 }
  0xa8   :  { %2029 = vmatprep.subr.mxu1 %v2302_v1 }
  0xa9   :  { %2030 = vmatpush3.msra.mxu1 %v2389_v31 }
  0xaa   :  { %2045 = vmatprep.subr.mxu1 %v2302_v1 }
 0x152   :  { %v2002_v38 = vpop.f32.mrf.mxu1 }
 0x153   :  { %v2417_v39 = vadd.f32 %v2002_v38, %v1823_v37 }
 0x154   :  { %v393_v40 = vpop.f32.mrf.mxu1 }
 0x155   :  { %v394_v57 = vadd.f32 %v1823_v37, %v393_v40  ;;  %v29_v40 = vld [vmem:[%s2714_s0 + $0x8] sm:$0xff] }
 0x156   :  { %v2005_v41 = vpop.f32.mrf.mxu1  ;;  %vm71_vm11 = vcmp.ne.s32.totalorder %v29_v40, 0 }
 0x157   :  { %v2419_v42 = vadd.f32 %v2005_v41, %v1823_v37  ;;  %v79_v41 = vsel %vm71_vm11, 1, %v2301_v0 }
 0x158   :  { %v403_v43 = vpop.f32.mrf.mxu1 }
 0x159   :  { %v2421_v44 = vadd.f32 %v1823_v37, %v403_v43  ;;  %v80_v43 = vsel %vm72_vm12, 1, %v2301_v0 }
 0x15a   :  { %v2008_v45 = vpop.f32.mrf.mxu1 }
 0x15b   :  { %v2423_v46 = vadd.f32 %v2008_v45, %v1823_v37  ;;  %v82_v45 = vsel %vm74_vm14, 1, %v2301_v0 }
 0x15c   :  { %v413_v47 = vpop.f32.mrf.mxu1 }
 0x15d   :  { %v2425_v48 = vadd.f32 %v1823_v37, %v413_v47  ;;  %v161_v47 = vld [vmem:[#allocation2 + $0xf8] sm:$0xff] }
 0x15e   :  { %v2011_v49 = vpop.f32.mrf.mxu1  ;;  %1974 = vmatpush3.msra.mxu0 %v161_v47 }
 0x15f   :  { %v2427_v50 = vadd.f32 %v2011_v49, %v1823_v37  ;;  %1975 = vmatprep.subr.mxu0 %v2302_v1  ;;  %v160_v49 = vld [vmem:[#allocation2 + $0xf0] sm:$0xff] }
 0x160   :  { %v423_v51 = vpop.f32.mrf.mxu1  ;;  %1976 = vmatpush3.msra.mxu0 %v160_v49 }
 0x161   :  { %v2431_v53 = vadd.f32 %v1823_v37, %v423_v51  ;;  %v83_v51 = vsel %vm75_vm15, 1, %v2301_v0  ;;  %1977 = vmatprep.subr.mxu0 %v2302_v1 }
 0x162   :  { %v510_v54 = vpop.f32.mrf.mxu1 }
 0x163   :  { %v525_v55 = vadd.f32 %v2429_v52, %v510_v54  ;;  %v514_v58 = vadd.f32 %v510_v54, %v394_v57  ;;  %v159_v54 = vld [vmem:[#allocation2 + $0xe8] sm:$0xff] }
 0x164   :  { %v2022_v56 = vpop.f32.mrf.mxu1  ;;  %1978 = vmatpush3.msra.mxu0 %v159_v54 }
 0x165   :  { %527 = vrot.lane.b32.xlu1 %v525_v55, %s2304_s7  ;;  %v1833_v59 = vmul.f32 -1.442695, %v514_v58  ;;  %1979 = vmatprep.subr.mxu0 %v2302_v1  ;;  %v158_v55 = vld [vmem:[#allocation2 + $0xe0] sm:$0xff]  ;;  %v84_v56 = vsel %vm76_vm2, 1, %v2301_v0  ;;  %v156_v58 = vld [vmem:[#allocation2 + $0xd0] sm:$0xff] }
 0x166   :  { %1980 = vmatpush3.msra.mxu0 %v158_v55 }
 0x167   :  { %2226 = vpow2.f32 %v1833_v59  ;;  %1981 = vmatprep.subr.mxu0 %v2302_v1  ;;  %v85_v59 = vsel %vm77_vm3, 1, %v2301_v0 }
 0x174   :  { %v2227_v60 = vpop.eup %2226 }
 0x175   :  { %v518_v61 = vadd.f32 1.0, %v2227_v60  ;;  %v155_v60 = vld [vmem:[#allocation2 + $0xc8] sm:$0xff] }
 0x177   :  { %2228 = vrcp.f32 %v518_v61  ;;  %v154_v61 = vld [vmem:[#allocation2 + $0xc0] sm:$0xff] }
 0x184   :  { %v2229_v62 = vpop.eup %2228 }
 0x185   :  { %v537_v6 = vsub.f32 1.0, %v2229_v62  ;;  %v543_v8 = vmul.f32 0.0, %v2229_v62 }
 0x1d7   :  { %v528_v63 = vpop.permute.xlu1 %527 }
 0x1d8   :  { %v530_v2 = vmul.f32 %v2229_v62, %v528_v63 }
 0x1da   :  { %532 = vrot.lane.b32.xlu0 %v530_v2, %s2304_s7 }
 0x24c   :  { %v533_v3 = vpop.permute.xlu0 %532 }
 0x24d   :  { %v535_v4 = vadd.f32 %v533_v3, %v394_v57  ;;  %v157_v57 = vld [vmem:[#allocation2 + $0xd8] sm:$0xff] }
 0x24e   :  { %1982 = vmatpush3.msra.mxu0 %v157_v57 }
 0x24f   :  { %2230 = vtanh.f32 %v535_v4  ;;  %1983 = vmatprep.subr.mxu0 %v2302_v1 }
 0x250   :  { %1984 = vmatpush3.msra.mxu0 %v156_v58 }
 0x251   :  { %1985 = vmatprep.subr.mxu0 %v2302_v1 }
 0x252   :  { %1986 = vmatpush3.msra.mxu0 %v155_v60 }
 0x253   :  { %1987 = vmatprep.subr.mxu0 %v2302_v1 }
 0x254   :  { %1988 = vmatpush3.msra.mxu0 %v154_v61 }
 0x255   :  { %2034 = vmatprep.subr.mxu0 %v2302_v1 }
 0x25c   :  { %v2231_v5 = vpop.eup %2230 }
 0x25d   :  { %539 = vrot.lane.b32.xlu1 %v2231_v5, %s2305_s8 }
 0x2cf   :  { %v540_v7 = vpop.permute.xlu1 %539 }
 0x2d0   :  { %v542_v9 = vmul.f32 %v540_v7, %v537_v6 }
 0x2d2   :  { %v2437_v10 = vadd.f32 %v543_v8, %v542_v9 }
 0x2d4   :  { %546 = vrot.lane.b32.xlu0 %v2437_v10, %s2305_s8 }
 0x346   :  { %v547_v11 = vpop.permute.xlu0 %546 }
 0x347   :  { %2032 = vmatmul.mubr.msk.f32.vlgmr.msra.gmra.mxu1 %vm302_vm1, %v547_v11 }
 0x348   :  { %2046 = vmatpush3.msra.mxu1 %v2370_v23  ;;  %2053 = vmatprep.mubr.msk.f32.mxu1 %vm2303_vm0, %v2302_v1 }
 0x349   :  { %2047 = vmatprep.subr.mxu1 %v2302_v1 }
 0x34a   :  { %2048 = vmatpush3.msra.mxu1 %v2375_v25 }
 0x34b   :  { %2049 = vmatprep.subr.mxu1 %v2302_v1 }
 0x34c   :  { %2050 = vmatpush3.msra.mxu1 %v2381_v28 }
 0x34d   :  { %2051 = vmatprep.subr.mxu1 %v2302_v1 }
 0x34e   :  { %2052 = vmatpush3.msra.mxu1 %v2389_v31 }
 0x34f   :  { %2067 = vmatprep.subr.mxu1 %v2302_v1 }
 0x407   :  { %v616_v12 = vpop.f32.mrf.mxu1 }
 0x408   :  { %v627_v13 = vadd.f32 %v616_v12, %v2429_v52  ;;  %v620_v17 = vadd.f32 %v616_v12, %v2417_v39 }
 0x409   :  { %v2033_v14 = vpop.f32.mrf.mxu1 }
 0x40a   :  { %629 = vrot.lane.b32.xlu1 %v627_v13, %s2304_s7  ;;  %v1835_v18 = vmul.f32 -1.442695, %v620_v17 }
 0x40c   :  { %2232 = vpow2.f32 %v1835_v18 }
 0x419   :  { %v2233_v19 = vpop.eup %2232 }
 0x41a   :  { %v624_v20 = vadd.f32 1.0, %v2233_v19 }
 0x41c   :  { %2234 = vrcp.f32 %v624_v20 }
 0x429   :  { %v2455_v21 = vpop.eup %2234 }
 0x42a   :  { %v639_v63 = vsub.f32 1.0, %v2455_v21  ;;  %v645_v3 = vmul.f32 %v2455_v21, %v2437_v10 }
 0x47c   :  { %v630_v22 = vpop.permute.xlu1 %629 }
 0x47d   :  { %v632_v24 = vmul.f32 %v2455_v21, %v630_v22 }
 0x47f   :  { %634 = vrot.lane.b32.xlu0 %v632_v24, %s2304_s7 }
 0x483   :  { %39 = vperm.xlu0 %2223, %v28_v26  }
 0x487   :  { %87 = vperm.xlu0 %2223, %v78_v27  }
 0x48b   :  { %45 = vperm.xlu0 %2223, %v30_v29  }
 0x48f   :  { %48 = vperm.xlu0 %2223, %v31_v30  }
 0x493   :  { %51 = vperm.xlu0 %2223, %v32_v32  }
 0x497   :  { %54 = vperm.xlu0 %2223, %v33_v33  }
 0x49b   :  { %57 = vperm.xlu0 %2223, %v34_v34  }
 0x49f   :  { %60 = vperm.xlu0 %2223, %v35_v35  }
 0x4f1   :  { %v635_v36 = vpop.permute.xlu0 %634 }
 0x4f2   :  { %v637_v37 = vadd.f32 %v635_v36, %v2417_v39  ;;  %v81_v39 = vsel %vm73_vm13, 1, %v2301_v0 }
 0x4f4   :  { %2236 = vtanh.f32 %v637_v37 }
 0x4fe   :  { %v40_v62 = vpop.permute.xlu0 %39 }
 0x4ff   :  { %vm62_vm8 = vcmp.eq.s32.totalorder %v40_v62, %v2362_v16 }
 0x501   :  { %v2237_v38 = vpop.eup %2236 }
 0x502   :  { %641 = vrot.lane.b32.xlu1 %v2237_v38, %s2305_s8  ;;  %v88_v0 = vpop.permute.xlu0 %87 }
 0x503   :  { %vm110_vm5 = vcmp.eq.s32.totalorder %v88_v0, 1 }
 0x504   :  { %vm118_vm10 = vmand %vm62_vm8, %vm110_vm5 }
 0x505   :  { %v1806_v18 = vsel %vm118_vm10, 1.0, %v2302_v1 }
 0x506   :  { %42 = vperm.xlu1 %2224, %v29_v40   ;;  %v46_v6 = vpop.permute.xlu0 %45 }
 0x507   :  { %vm64_vm11 = vcmp.eq.s32.totalorder %v46_v6, %v2362_v16 }
 0x50a   :  { %90 = vperm.xlu1 %2224, %v79_v41   ;;  %v49_v8 = vpop.permute.xlu0 %48 }
 0x50b   :  { %vm65_vm14 = vcmp.eq.s32.totalorder %v49_v8, %v2362_v16 }
 0x50e   :  { %93 = vperm.xlu1 %2224, %v80_v43   ;;  %v52_v11 = vpop.permute.xlu0 %51 }
 0x50f   :  { %vm66_vm3 = vcmp.eq.s32.totalorder %v52_v11, %v2362_v16 }
 0x512   :  { %96 = vperm.xlu1 %2224, %v81_v39   ;;  %v55_v10 = vpop.permute.xlu0 %54 }
 0x513   :  { %vm67_vm5 = vcmp.eq.s32.totalorder %v55_v10, %v2362_v16 }
 0x516   :  { %99 = vperm.xlu1 %2224, %v82_v45   ;;  %v58_v20 = vpop.permute.xlu0 %57 }
 0x517   :  { %vm68_vm8 = vcmp.eq.s32.totalorder %v58_v20, %v2362_v16 }
 0x51a   :  { %102 = vperm.xlu1 %2224, %v83_v51   ;;  %v61_v33 = vpop.permute.xlu0 %60 }
 0x51e   :  { %105 = vperm.xlu1 %2224, %v84_v56  }
 0x522   :  { %108 = vperm.xlu1 %2224, %v85_v59  }
 0x574   :  { %v642_v2 = vpop.permute.xlu1 %641 }
 0x575   :  { %v644_v4 = vmul.f32 %v642_v2, %v639_v63 }
 0x577   :  { %v2504_v5 = vadd.f32 %v645_v3, %v644_v4 }
 0x579   :  { %648 = vrot.lane.b32.xlu0 %v2504_v5, %s2305_s8 }
 0x581   :  { %v43_v7 = vpop.permute.xlu1 %42 }
 0x582   :  { %vm63_vm6 = vcmp.eq.s32.totalorder %v43_v7, %v2362_v16 }
 0x585   :  { %v91_v9 = vpop.permute.xlu1 %90 }
 0x586   :  { %vm111_vm4 = vcmp.eq.s32.totalorder %v91_v9, 1 }
 0x587   :  { %vm119_vm9 = vmand %vm63_vm6, %vm111_vm4 }
 0x588   :  { %v1807_v17 = vsel %vm119_vm9, 1.0, %v2302_v1 }
 0x589   :  { %v94_v12 = vpop.permute.xlu1 %93  ;;  %v142_v21 = vadd.f32 %v1807_v17, %v1806_v18 }
 0x58a   :  { %vm112_vm7 = vcmp.eq.s32.totalorder %v94_v12, 1 }
 0x58b   :  { %vm120_vm13 = vmand %vm64_vm11, %vm112_vm7  ;;  %vm69_vm11 = vcmp.eq.s32.totalorder %v61_v33, %v2362_v16 }
 0x58c   :  { %v1808_v19 = vsel %vm120_vm13, 1.0, %v2302_v1 }
 0x58d   :  { %v97_v13 = vpop.permute.xlu1 %96  ;;  %v143_v26 = vadd.f32 %v1808_v19, %v142_v21 }
 0x58e   :  { %vm113_vm12 = vcmp.eq.s32.totalorder %v97_v13, 1 }
 0x58f   :  { %vm121_vm2 = vmand %vm65_vm14, %vm113_vm12  ;;  %vm149_vm14 = vcmask 523264  }
 0x590   :  { %v1809_v24 = vsel %vm121_vm2, 1.0, %v2302_v1 }
 0x591   :  { %v100_v14 = vpop.permute.xlu1 %99  ;;  %v144_v29 = vadd.f32 %v1809_v24, %v143_v26 }
 0x592   :  { %vm114_vm15 = vcmp.eq.s32.totalorder %v100_v14, 1 }
 0x593   :  { %vm122_vm4 = vmand %vm66_vm3, %vm114_vm15 }
 0x594   :  { %v1810_v27 = vsel %vm122_vm4, 1.0, %v2302_v1 }
 0x595   :  { %v103_v22 = vpop.permute.xlu1 %102  ;;  %v145_v34 = vadd.f32 %v1810_v27, %v144_v29 }
 0x596   :  { %vm115_vm6 = vcmp.eq.s32.totalorder %v103_v22, 1 }
 0x597   :  { %vm123_vm7 = vmand %vm67_vm5, %vm115_vm6 }
 0x598   :  { %v1811_v32 = vsel %vm123_vm7, 1.0, %v2302_v1 }
 0x599   :  { %v106_v30 = vpop.permute.xlu1 %105  ;;  %v146_v36 = vadd.f32 %v1811_v32, %v145_v34 }
 0x59a   :  { %vm116_vm9 = vcmp.eq.s32.totalorder %v106_v30, 1 }
 0x59b   :  { %vm124_vm10 = vmand %vm68_vm8, %vm116_vm9 }
 0x59c   :  { %v1812_v35 = vsel %vm124_vm10, 1.0, %v2302_v1 }
 0x59d   :  { %v109_v37 = vpop.permute.xlu1 %108  ;;  %v147_v38 = vadd.f32 %v1812_v35, %v146_v36 }
 0x59e   :  { %vm117_vm12 = vcmp.eq.s32.totalorder %v109_v37, 1 }
 0x59f   :  { %vm125_vm13 = vmand %vm69_vm11, %vm117_vm12 }
 0x5a0   :  { %v1813_v40 = vsel %vm125_vm13, 1.0, %v2302_v1 }
 0x5a1   :  { %v2524_v41 = vadd.f32 %v1813_v40, %v147_v38 }
 0x5a3   :  { %1990 = vmatmul.mubr.msk.f32.vlgmr.msra.gmra.mxu0 %vm149_vm14, %v2524_v41 }
 0x5a4   :  { %2035 = vmatpush3.msra.mxu0 %v2370_v23  ;;  %2042 = vmatprep.mubr.msk.f32.mxu0 %vm2303_vm0, %v2302_v1 }
 0x5a5   :  { %2036 = vmatprep.subr.mxu0 %v2302_v1 }
 0x5a6   :  { %2037 = vmatpush3.msra.mxu0 %v2375_v25 }
 0x5a7   :  { %2038 = vmatprep.subr.mxu0 %v2302_v1 }
 0x5a8   :  { %2039 = vmatpush3.msra.mxu0 %v2381_v28 }
 0x5a9   :  { %2040 = vmatprep.subr.mxu0 %v2302_v1 }
 0x5aa   :  { %2041 = vmatpush3.msra.mxu0 %v2389_v31 }
 0x5ab   :  { %2056 = vmatprep.subr.mxu0 %v2302_v1 }
 0x5eb   :  { %v649_v16 = vpop.permute.xlu0 %648 }
 0x5ec   :  { %2043 = vmatmul.mubr.msk.f32.vlgmr.msra.gmra.mxu0 %vm302_vm1, %v649_v16 }
 0x5ed   :  { %2057 = vmatpush3.msra.mxu0 %v2370_v23  ;;  %2064 = vmatprep.mubr.msk.f32.mxu0 %vm2303_vm0, %v2302_v1 }
 0x5ee   :  { %2058 = vmatprep.subr.mxu0 %v2302_v1 }
 0x5ef   :  { %2059 = vmatpush3.msra.mxu0 %v2375_v25 }
 0x5f0   :  { %2060 = vmatprep.subr.mxu0 %v2302_v1 }
 0x5f1   :  { %2061 = vmatpush3.msra.mxu0 %v2381_v28 }
 0x5f2   :  { %2062 = vmatprep.subr.mxu0 %v2302_v1 }
 0x5f3   :  { %2063 = vmatpush3.msra.mxu0 %v2389_v31 }
 0x5f4   :  { %2078 = vmatprep.subr.mxu0 %v2302_v1 }
 0x663   :  { %v2549_v43 = vpop.f32.mrf.mxu0 }
 0x665   :  { %v1991_v39 = vpop.f32.mrf.mxu0 }
 0x6ac   :  { %v718_v45 = vpop.f32.mrf.mxu0 }
 0x6ad   :  { %v729_v47 = vadd.f32 %v718_v45, %v2429_v52  ;;  %v722_v51 = vadd.f32 %v718_v45, %v2421_v44 }
 0x6ae   :  { %v2044_v49 = vpop.f32.mrf.mxu0 }
 0x6af   :  { %731 = vrot.lane.b32.xlu1 %v729_v47, %s2304_s7  ;;  %v1837_v54 = vmul.f32 -1.442695, %v722_v51 }
 0x6b1   :  { %2238 = vpow2.f32 %v1837_v54 }
 0x6be   :  { %v2239_v55 = vpop.eup %2238 }
 0x6bf   :  { %v726_v56 = vadd.f32 1.0, %v2239_v55 }
 0x6c1   :  { %2240 = vrcp.f32 %v726_v56 }
 0x6ce   :  { %v2241_v57 = vpop.eup %2240 }
 0x6cf   :  { %v741_v63 = vsub.f32 1.0, %v2241_v57  ;;  %v747_v3 = vmul.f32 %v2241_v57, %v2504_v5 }
 0x721   :  { %v732_v58 = vpop.permute.xlu1 %731 }
 0x722   :  { %v734_v59 = vmul.f32 %v2241_v57, %v732_v58 }
 0x724   :  { %736 = vrot.lane.b32.xlu0 %v734_v59, %s2304_s7 }
 0x796   :  { %v737_v60 = vpop.permute.xlu0 %736 }
 0x797   :  { %v739_v61 = vadd.f32 %v737_v60, %v2421_v44 }
 0x799   :  { %2242 = vtanh.f32 %v739_v61 }
 0x7a6   :  { %v2243_v62 = vpop.eup %2242 }
 0x7a7   :  { %743 = vrot.lane.b32.xlu1 %v2243_v62, %s2305_s8 }
 0x819   :  { %v744_v2 = vpop.permute.xlu1 %743 }
 0x81a   :  { %v746_v4 = vmul.f32 %v744_v2, %v741_v63 }
 0x81c   :  { %v748_v0 = vadd.f32 %v747_v3, %v746_v4 }
 0x81e   :  { %750 = vrot.lane.b32.xlu0 %v748_v0, %s2305_s8 }
 0x890   :  { %v751_v6 = vpop.permute.xlu0 %750 }
 0x891   :  { %2054 = vmatmul.mubr.msk.f32.vlgmr.msra.gmra.mxu1 %vm302_vm1, %v751_v6 }
 0x892   :  { %2068 = vmatpush3.msra.mxu1 %v2370_v23  ;;  %2075 = vmatprep.mubr.msk.f32.mxu1 %vm2303_vm0, %v2302_v1 }
 0x893   :  { %2069 = vmatprep.subr.mxu1 %v2302_v1 }
 0x894   :  { %2070 = vmatpush3.msra.mxu1 %v2375_v25 }
 0x895   :  { %2071 = vmatprep.subr.mxu1 %v2302_v1 }
 0x896   :  { %2072 = vmatpush3.msra.mxu1 %v2381_v28 }
 0x897   :  { %2073 = vmatprep.subr.mxu1 %v2302_v1 }
 0x898   :  { %2074 = vmatpush3.msra.mxu1 %v2389_v31 }
 0x899   :  { %2089 = vmatprep.subr.mxu1 %v2302_v1 }
 0x951   :  { %v820_v44 = vpop.f32.mrf.mxu1 }
 0x952   :  { %v831_v5 = vadd.f32 %v820_v44, %v2429_v52  ;;  %v824_v8 = vadd.f32 %v820_v44, %v2419_v42 }
 0x953   :  { %v2055_v7 = vpop.f32.mrf.mxu1 }
 0x954   :  { %833 = vrot.lane.b32.xlu1 %v831_v5, %s2304_s7  ;;  %v1839_v9 = vmul.f32 -1.442695, %v824_v8 }
 0x956   :  { %2244 = vpow2.f32 %v1839_v9 }
 0x963   :  { %v2245_v11 = vpop.eup %2244 }
 0x964   :  { %v828_v12 = vadd.f32 1.0, %v2245_v11 }
 0x966   :  { %2246 = vrcp.f32 %v828_v12 }
 0x973   :  { %v2247_v13 = vpop.eup %2246 }
 0x974   :  { %v843_v20 = vsub.f32 1.0, %v2247_v13  ;;  %v849_v22 = vmul.f32 %v2247_v13, %v748_v0 }
 0x9c6   :  { %v834_v10 = vpop.permute.xlu1 %833 }
 0x9c7   :  { %v836_v14 = vmul.f32 %v2247_v13, %v834_v10 }
 0x9c9   :  { %838 = vrot.lane.b32.xlu0 %v836_v14, %s2304_s7 }
 0xa3b   :  { %v839_v17 = vpop.permute.xlu0 %838 }
 0xa3c   :  { %v841_v18 = vadd.f32 %v839_v17, %v2419_v42 }
 0xa3e   :  { %2248 = vtanh.f32 %v841_v18 }
 0xa4b   :  { %v2249_v19 = vpop.eup %2248 }
 0xa4c   :  { %845 = vrot.lane.b32.xlu1 %v2249_v19, %s2305_s8 }
 0xabe   :  { %v846_v21 = vpop.permute.xlu1 %845 }
 0xabf   :  { %v848_v24 = vmul.f32 %v846_v21, %v843_v20 }
 0xac1   :  { %v850_v26 = vadd.f32 %v849_v22, %v848_v24 }
 0xac3   :  { %852 = vrot.lane.b32.xlu0 %v850_v26, %s2305_s8 }
 0xb35   :  { %v853_v27 = vpop.permute.xlu0 %852 }
 0xb36   :  { %2065 = vmatmul.mubr.msk.f32.vlgmr.msra.gmra.mxu0 %vm302_vm1, %v853_v27 }
 0xb37   :  { %2079 = vmatpush3.msra.mxu0 %v2370_v23  ;;  %2086 = vmatprep.mubr.msk.f32.mxu0 %vm2303_vm0, %v2302_v1 }
 0xb38   :  { %2080 = vmatprep.subr.mxu0 %v2302_v1 }
 0xb39   :  { %2081 = vmatpush3.msra.mxu0 %v2375_v25 }
 0xb3a   :  { %2082 = vmatprep.subr.mxu0 %v2302_v1 }
 0xb3b   :  { %2083 = vmatpush3.msra.mxu0 %v2381_v28 }
 0xb3c   :  { %2084 = vmatprep.subr.mxu0 %v2302_v1 }
 0xb3d   :  { %2085 = vmatpush3.msra.mxu0 %v2389_v31 }
 0xb3e   :  { %2100 = vmatprep.subr.mxu0 %v2302_v1 }
 0xbf6   :  { %v922_v42 = vpop.f32.mrf.mxu0 }
 0xbf7   :  { %v933_v29 = vadd.f32 %v922_v42, %v2429_v52  ;;  %v926_v32 = vadd.f32 %v922_v42, %v2425_v48  ;;  %v1266_v42 = vld [vmem:[#allocation2 + $0x70] sm:$0xff] }
 0xbf8   :  { %v2066_v30 = vpop.f32.mrf.mxu0 }
 0xbf9   :  { %935 = vrot.lane.b32.xlu1 %v933_v29, %s2304_s7  ;;  %v1841_v33 = vmul.f32 -1.442695, %v926_v32  ;;  %v1265_v29 = vld [vmem:[#allocation2 + $0x68] sm:$0xff]  ;;  %v1264_v30 = vld [vmem:[#allocation2 + $0x60] sm:$0xff]  ;;  %v1263_v32 = vld [vmem:[#allocation2 + $0x58] sm:$0xff] }
 0xbfb   :  { %2250 = vpow2.f32 %v1841_v33  ;;  %v1262_v33 = vld [vmem:[#allocation2 + $0x50] sm:$0xff] }
 0xc08   :  { %v2251_v34 = vpop.eup %2250 }
 0xc09   :  { %v930_v35 = vadd.f32 1.0, %v2251_v34  ;;  %v1261_v34 = vld [vmem:[#allocation2 + $0x48] sm:$0xff] }
 0xc0b   :  { %2252 = vrcp.f32 %v930_v35  ;;  %v1260_v35 = vld [vmem:[#allocation2 + $0x40] sm:$0xff] }
 0xc18   :  { %v2253_v36 = vpop.eup %2252 }
 0xc19   :  { %v945_v45 = vsub.f32 1.0, %v2253_v36  ;;  %v951_v49 = vmul.f32 %v2253_v36, %v850_v26 }
 0xc6b   :  { %v936_v37 = vpop.permute.xlu1 %935 }
 0xc6c   :  { %v938_v38 = vmul.f32 %v2253_v36, %v936_v37  ;;  %v1259_v36 = vld [vmem:[%s2715_s1] sm:$0xff] }
 0xc6e   :  { %940 = vrot.lane.b32.xlu0 %v938_v38, %s2304_s7 }
 0xce0   :  { %v941_v40 = vpop.permute.xlu0 %940 }
 0xce1   :  { %v943_v16 = vadd.f32 %v941_v40, %v2425_v48 }
 0xce3   :  { %2254 = vtanh.f32 %v943_v16 }
 0xcf0   :  { %v2255_v39 = vpop.eup %2254 }
 0xcf1   :  { %947 = vrot.lane.b32.xlu1 %v2255_v39, %s2305_s8 }
 0xd63   :  { %v948_v47 = vpop.permute.xlu1 %947 }
 0xd64   :  { %v950_v51 = vmul.f32 %v948_v47, %v945_v45 }
 0xd66   :  { %v952_v54 = vadd.f32 %v951_v49, %v950_v51 }
 0xd68   :  { %954 = vrot.lane.b32.xlu0 %v952_v54, %s2305_s8 }
 0xdda   :  { %v955_v55 = vpop.permute.xlu0 %954 }
 0xddb   :  { %2076 = vmatmul.mubr.msk.f32.vlgmr.msra.gmra.mxu1 %vm302_vm1, %v955_v55  ;;  %v1354_v55 = vld [vmem:[#allocation2 + $0xb8] sm:$0xff] }
 0xddc   :  { %2090 = vmatpush3.msra.mxu1 %v2370_v23  ;;  %2097 = vmatprep.mubr.msk.f32.mxu1 %vm2303_vm0, %v2302_v1 }
 0xddd   :  { %2091 = vmatprep.subr.mxu1 %v2302_v1 }
 0xdde   :  { %2092 = vmatpush3.msra.mxu1 %v2375_v25 }
 0xddf   :  { %2093 = vmatprep.subr.mxu1 %v2302_v1 }
 0xde0   :  { %2094 = vmatpush3.msra.mxu1 %v2381_v28 }
 0xde1   :  { %2095 = vmatprep.subr.mxu1 %v2302_v1 }
 0xde2   :  { %2096 = vmatpush3.msra.mxu1 %v2389_v31 }
 0xde3   :  { %2119 = vmatprep.subr.mxu1 %v2302_v1 }
 0xe9b   :  { %v1024_v48 = vpop.f32.mrf.mxu1 }
 0xe9c   :  { %v1035_v23 = vadd.f32 %v1024_v48, %v2429_v52  ;;  %v1028_v57 = vadd.f32 %v1024_v48, %v2423_v46  ;;  %v1353_v48 = vld [vmem:[#allocation2 + $0xb0] sm:$0xff] }
 0xe9d   :  { %v2077_v56 = vpop.f32.mrf.mxu1 }
 0xe9e   :  { %1037 = vrot.lane.b32.xlu1 %v1035_v23, %s2304_s7  ;;  %v1843_v58 = vmul.f32 -1.442695, %v1028_v57  ;;  %v1352_v23 = vld [vmem:[#allocation2 + $0xa8] sm:$0xff]  ;;  %v1351_v57 = vld [vmem:[#allocation2 + $0xa0] sm:$0xff] }
 0xea0   :  { %2256 = vpow2.f32 %v1843_v58  ;;  %v1848_v58 = vld [vmem:[#allocation2 + $0x218] ss:$0 sm:$0xff] }
 0xead   :  { %v2257_v25 = vpop.eup %2256 }
 0xeae   :  { %v1032_v59 = vadd.f32 1.0, %v2257_v25  ;;  %v1350_v25 = vld [vmem:[#allocation2 + $0x98] sm:$0xff] }
 0xeb0   :  { %2258 = vrcp.f32 %v1032_v59 }
 0xebd   :  { %v2259_v28 = vpop.eup %2258 }
 0xebe   :  { %v1047_v2 = vsub.f32 1.0, %v2259_v28  ;;  %v1053_v4 = vmul.f32 %v2259_v28, %v952_v54 }
 0xf10   :  { %v1038_v60 = vpop.permute.xlu1 %1037 }
 0xf11   :  { %v1040_v61 = vmul.f32 %v2259_v28, %v1038_v60  ;;  %v1349_v28 = vld [vmem:[#allocation2 + $0x90] sm:$0xff]  ;;  %v1348_v60 = vld [vmem:[#allocation2 + $0x88] sm:$0xff] }
 0xf13   :  { %1042 = vrot.lane.b32.xlu0 %v1040_v61, %s2304_s7 }
 0xf85   :  { %v1043_v31 = vpop.permute.xlu0 %1042 }
 0xf86   :  { %v1045_v62 = vadd.f32 %v1043_v31, %v2423_v46  ;;  %v1347_v31 = vld [vmem:[#allocation2 + $0x80] sm:$0xff] }
 0xf88   :  { %2260 = vtanh.f32 %v1045_v62 }
 0xf95   :  { %v2261_v63 = vpop.eup %2260 }
 0xf96   :  { %1049 = vrot.lane.b32.xlu1 %v2261_v63, %s2305_s8 }
0x1008   :  { %v1050_v3 = vpop.permute.xlu1 %1049 }
0x1009   :  { %v1052_v0 = vmul.f32 %v1050_v3, %v1047_v2  ;;  %v150_v3 = vsel %vm149_vm14, %v2524_v41, 0.0  ;;  %v1456_v41 = vld [vmem:[#allocation2 + $0x100] sm:$0xff] }
0x100b   :  { %v1054_v6 = vadd.f32 %v1053_v4, %v1052_v0  ;;  %v1459_v4 = vld [vmem:[#allocation2 + $0x118] sm:$0xff] }
0x100c   :  { %v1539_v0 = vld [vmem:[#allocation2 + $0x138] sm:$0xff] }
0x100d   :  { %1056 = vrot.lane.b32.xlu0 %v1054_v6, %s2305_s8 }
0x107f   :  { %v1057_v44 = vpop.permute.xlu0 %1056 }
0x1080   :  { %2087 = vmatmul.mubr.msk.f32.vlgmr.msra.gmra.mxu0 %vm302_vm1, %v1057_v44  ;;  %v1538_v44 = vld [vmem:[#allocation2 + $0x130] sm:$0xff] }
0x1081   :  { %2116 = vmatprep.mubr.msk.f32.mxu0 %vm2303_vm0, %v2302_v1 }
0x1140   :  { %v1126_v5 = vpop.f32.mrf.mxu0 }
0x1141   :  { %v1137_v46 = vadd.f32 %v1126_v5, %v2429_v52  ;;  %v1130_v8 = vadd.f32 %v1126_v5, %v2431_v53  ;;  %v1457_v5 = vld [vmem:[#allocation2 + $0x108] sm:$0xff] }
0x1142   :  { %v2088_v7 = vpop.f32.mrf.mxu0 }
0x1143   :  { %1139 = vrot.lane.b32.xlu1 %v1137_v46, %s2304_s7  ;;  %v1845_v9 = vmul.f32 -1.442695, %v1130_v8  ;;  %v1850_v8 = vld [vmem:[#allocation2 + $0x220] ss:$0 sm:$0xff] }
0x1145   :  { %2262 = vpow2.f32 %v1845_v9 }
0x1152   :  { %v2263_v11 = vpop.eup %2262 }
0x1153   :  { %v1134_v12 = vadd.f32 1.0, %v2263_v11 }
0x1155   :  { %2264 = vrcp.f32 %v1134_v12  ;;  %v1536_v12 = vld [vmem:[#allocation2 + $0x120] sm:$0xff] }
0x1162   :  { %v2265_v13 = vpop.eup %2264 }
0x1163   :  { %v1149_v20 = vsub.f32 1.0, %v2265_v13  ;;  %v1155_v22 = vmul.f32 %v2265_v13, %v1054_v6  ;;  %v1458_v6 = vld [vmem:[#allocation2 + $0x110] sm:$0xff] }
0x11b5   :  { %v1140_v10 = vpop.permute.xlu1 %1139 }
0x11b6   :  { %v1142_v14 = vmul.f32 %v2265_v13, %v1140_v10 }
0x11b8   :  { %1144 = vrot.lane.b32.xlu0 %v1142_v14, %s2304_s7 }
0x122a   :  { %v1145_v17 = vpop.permute.xlu0 %1144 }
0x122b   :  { %v1147_v18 = vadd.f32 %v1145_v17, %v2431_v53  ;;  %v1267_v53 = vld [vmem:[#allocation2 + $0x78] sm:$0xff] }
0x122c   :  { %2101 = vmatpush3.msra.mxu0 %v1267_v53  ;;  %v1633_v53 = vld [vmem:[#allocation2 + $0x1a0] sm:$0xff] }
0x122d   :  { %2266 = vtanh.f32 %v1147_v18  ;;  %2102 = vmatprep.subr.mxu0 %v2302_v1 }
0x122e   :  { %2103 = vmatpush3.msra.mxu0 %v1266_v42  ;;  %v1632_v42 = vld [vmem:[#allocation2 + $0x198] sm:$0xff] }
0x122f   :  { %2104 = vmatprep.subr.mxu0 %v2302_v1 }
0x1230   :  { %2105 = vmatpush3.msra.mxu0 %v1265_v29  ;;  %v1631_v29 = vld [vmem:[#allocation2 + $0x190] sm:$0xff] }
0x1231   :  { %2106 = vmatprep.subr.mxu0 %v2302_v1 }
0x1232   :  { %2107 = vmatpush3.msra.mxu0 %v1264_v30  ;;  %v1630_v30 = vld [vmem:[#allocation2 + $0x188] sm:$0xff] }
0x1233   :  { %2108 = vmatprep.subr.mxu0 %v2302_v1 }
0x1234   :  { %2109 = vmatpush3.msra.mxu0 %v1263_v32  ;;  %v1629_v32 = vld [vmem:[#allocation2 + $0x180] sm:$0xff] }
0x1235   :  { %2110 = vmatprep.subr.mxu0 %v2302_v1 }
0x1236   :  { %2111 = vmatpush3.msra.mxu0 %v1262_v33  ;;  %v1628_v33 = vld [vmem:[#allocation2 + $0x178] sm:$0xff] }
0x1237   :  { %2112 = vmatprep.subr.mxu0 %v2302_v1 }
0x1238   :  { %2113 = vmatpush3.msra.mxu0 %v1261_v34  ;;  %v1627_v34 = vld [vmem:[#allocation2 + $0x170] sm:$0xff] }
0x1239   :  { %2114 = vmatprep.subr.mxu0 %v2302_v1 }
0x123a   :  { %v2267_v19 = vpop.eup %2266  ;;  %2115 = vmatpush3.msra.mxu0 %v1260_v35 }
0x123b   :  { %1151 = vrot.lane.b32.xlu1 %v2267_v19, %s2305_s8  ;;  %2117 = vmatmul.mubr.msk.f32.vlgmr.msra.gmra.mxu0 %vm149_vm14, %v1259_v36  ;;  %v1434_v19 = vld [vmem:[%s2715_s1 + $0x8] sm:$0xff] }
0x123c   :  { %2138 = vmatprep.subr.mxu0 %v2302_v1  ;;  %2146 = vmatprep.mubr.msk.f32.mxu0 %vm2303_vm0, %v2302_v1  ;;  %v1626_v36 = vld [vmem:[#allocation2 + $0x168] sm:$0xff] }
0x123d   :  { %2139 = vmatpush3.msra.mxu0 %v1459_v4 }
0x123e   :  { %2140 = vmatprep.subr.mxu0 %v2302_v1 }
0x123f   :  { %2141 = vmatpush3.msra.mxu0 %v1458_v6  ;;  %v1854_v6 = vld [vmem:[#allocation2 + $0x228] ss:$0 sm:$0xff] }
0x1240   :  { %2142 = vmatprep.subr.mxu0 %v2302_v1 }
0x1241   :  { %2143 = vmatpush3.msra.mxu0 %v1457_v5 }
0x1242   :  { %2144 = vmatprep.subr.mxu0 %v2302_v1 }
0x1243   :  { %2145 = vmatpush3.msra.mxu0 %v1456_v41  ;;  %v1715_v41 = vld [vmem:[#allocation2 + $0x1d0] sm:$0xff] }
0x1244   :  { %2160 = vmatprep.subr.mxu0 %v2302_v1 }
0x12ad   :  { %v1152_v21 = vpop.permute.xlu1 %1151 }
0x12ae   :  { %v1154_v24 = vmul.f32 %v1152_v21, %v1149_v20  ;;  %v2306_v20 = vmov 1   ;;  %v1637_v21 = vld [vmem:[#allocation2 + $0x1c0] sm:$0xff] }
0x12b0   :  { %v2622_v26 = vadd.f32 %v1155_v22, %v1154_v24  ;;  %v1636_v24 = vld [vmem:[#allocation2 + $0x1b8] sm:$0xff] }
0x12b2   :  { %1158 = vrot.lane.b32.xlu0 %v2622_v26, %s2305_s8 }
0x1324   :  { %v1159_v27 = vpop.permute.xlu0 %1158 }
0x1325   :  { %2098 = vmatmul.mubr.msk.f32.vlgmr.msra.gmra.mxu1 %vm302_vm1, %v1159_v27  ;;  %v1634_v27 = vld [vmem:[#allocation2 + $0x1a8] sm:$0xff] }
0x1326   :  { %2135 = vmatprep.mubr.msk.f32.mxu1 %vm2303_vm0, %v2302_v1  ;;  %2120 = vmatpush3.msra.mxu1 %v1354_v55 }
0x1327   :  { %2121 = vmatprep.subr.mxu1 %v2302_v1 }
0x1328   :  { %2122 = vmatpush3.msra.mxu1 %v1353_v48 }
0x1329   :  { %2123 = vmatprep.subr.mxu1 %v2302_v1 }
0x132a   :  { %2124 = vmatpush3.msra.mxu1 %v1352_v23 }
0x132b   :  { %2125 = vmatprep.subr.mxu1 %v2302_v1 }
0x132c   :  { %2126 = vmatpush3.msra.mxu1 %v1351_v57 }
0x132d   :  { %2127 = vmatprep.subr.mxu1 %v2302_v1 }
0x132e   :  { %2128 = vmatpush3.msra.mxu1 %v1350_v25 }
0x132f   :  { %2129 = vmatprep.subr.mxu1 %v2302_v1 }
0x1330   :  { %2130 = vmatpush3.msra.mxu1 %v1349_v28 }
0x1331   :  { %2131 = vmatprep.subr.mxu1 %v2302_v1 }
0x1332   :  { %2132 = vmatpush3.msra.mxu1 %v1348_v60 }
0x1333   :  { %2133 = vmatprep.subr.mxu1 %v2302_v1 }
0x1334   :  { %2134 = vmatpush3.msra.mxu1 %v1347_v31 }
0x1335   :  { %2149 = vmatprep.subr.mxu1 %v2302_v1 }
0x13e5   :  { %v1228_v37 = vpop.f32.mrf.mxu1 }
0x13e6   :  { %v1239_v38 = vadd.f32 %v1228_v37, %v2429_v52  ;;  %v1232_v16 = vadd.f32 %v1228_v37, %v2427_v50  ;;  %v1342_v52 = vpop.f32.mrf.mxu0 }
0x13e7   :  { %v2099_v40 = vpop.f32.mrf.mxu1  ;;  %v1343_v59 = vadd.f32 %v1848_v58, %v1342_v52  ;;  %v1442_v52 = vshrl.u32 %v36_v15, 7  ;;  %v1435_v58 = vld [vmem:[#allocation2 + $0x140] sm:$0x3] }
0x13e8   :  { %1241 = vrot.lane.b32.xlu1 %v1239_v38, %s2304_s7  ;;  %v1847_v39 = vmul.f32 -1.442695, %v1232_v16  ;;  %v2118_v56 = vpop.f32.mrf.mxu0  ;;  %v1625_v38 = vld [vmem:[#allocation2 + $0x160] sm:$0xff]  ;;  %v1624_v40 = vld [vmem:[#allocation2 + $0x158] sm:$0xff]  ;;  %v1623_v16 = vld [vmem:[#allocation2 + $0x150] sm:$0xff] }
0x13e9   :  { %v1346_v61 = vmax.f32 %v1343_v59, 0.0  ;;  %v1452_v56 = vsub.s32 1, %v1442_v52  ;;  %v1443_v57 = vsub.s32 0, %v1442_v52 }
0x13ea   :  { %2268 = vpow2.f32 %v1847_v39  ;;  %v1622_v39 = vld [vmem:[#allocation2 + $0x148] sm:$0xff] }
0x13eb   :  { %2136 = vmatmul.mubr.msk.f32.vlgmr.msra.gmra.mxu1 %vm149_vm14, %v1346_v61  ;;  %v1453_v25 = vrot.slane %v1435_v58, %v1452_v56  ;;  %v1444_v60 = vrot.slane %v1435_v58, %v1443_v57 }
0x13ec   :  { %2157 = vmatprep.mubr.msk.f32.mxu1 %vm2303_vm0, %v2302_v1  ;;  %2150 = vmatpush3.msra.mxu1 %v1539_v0 }
0x13ed   :  { %2151 = vmatprep.subr.mxu1 %v2302_v1 }
0x13ee   :  { %2152 = vmatpush3.msra.mxu1 %v1538_v44 }
0x13ef   :  { %2153 = vmatprep.subr.mxu1 %v2302_v1 }
0x13f7   :  { %v2269_v45 = vpop.eup %2268 }
0x13f8   :  { %v1236_v47 = vadd.f32 1.0, %v2269_v45  ;;  %v1721_v45 = vld [vmem:[#allocation2 + $0x200] sm:$0xff] }
0x13fa   :  { %2270 = vrcp.f32 %v1236_v47  ;;  %v1720_v47 = vld [vmem:[#allocation2 + $0x1f8] sm:$0xff] }
0x1407   :  { %v2646_v49 = vpop.eup %2270 }
0x1408   :  { %v1251_v13 = vsub.f32 1.0, %v2646_v49  ;;  %v1257_v14 = vmul.f32 %v2646_v49, %v2622_v26  ;;  %v1635_v26 = vld [vmem:[#allocation2 + $0x1b0] sm:$0xff] }
0x145a   :  { %v1242_v51 = vpop.permute.xlu1 %1241 }
0x145b   :  { %v1244_v54 = vmul.f32 %v2646_v49, %v1242_v51  ;;  %v1719_v49 = vld [vmem:[#allocation2 + $0x1f0] sm:$0xff]  ;;  %v1718_v51 = vld [vmem:[#allocation2 + $0x1e8] sm:$0xff] }
0x145d   :  { %1246 = vrot.lane.b32.xlu0 %v1244_v54, %s2304_s7  ;;  %v1717_v54 = vld [vmem:[#allocation2 + $0x1e0] sm:$0xff] }
0x14ab   :  { %v1429_v46 = vpop.f32.mrf.mxu1 }
0x14ac   :  { %v1430_v9 = vadd.f32 %v1850_v8, %v1429_v46  ;;  %v1855_v46 = vld [vmem:[#allocation2 + $0x230] ss:$0 sm:$0xff] }
0x14ad   :  { %v2137_v7 = vpop.f32.mrf.mxu1 }
0x14ae   :  { %v1433_v11 = vmax.f32 %v1430_v9, 0.0 }
0x14cf   :  { %v1247_v62 = vpop.permute.xlu0 %1246 }
0x14d0   :  { %v1249_v63 = vadd.f32 %v1247_v62, %v2427_v50  ;;  %v1537_v50 = vld [vmem:[#allocation2 + $0x128] sm:$0xff] }
0x14d1   :  { %2154 = vmatpush3.msra.mxu1 %v1537_v50  ;;  %v1716_v50 = vld [vmem:[#allocation2 + $0x1d8] sm:$0xff] }
0x14d2   :  { %2272 = vtanh.f32 %v1249_v63  ;;  %2155 = vmatprep.subr.mxu1 %v2302_v1 }
0x14d3   :  { %2156 = vmatpush3.msra.mxu1 %v1536_v12  ;;  %v1856_v12 = vld [vmem:[#allocation2 + $0x238] ss:$0 sm:$0xff] }
0x14d4   :  { %2158 = vmatmul.mubr.msk.f32.vlgmr.msra.gmra.mxu1 %vm302_vm1, %v1433_v11  ;;  %2195 = vmatprep.subr.mxu1 %v2302_v1 }
0x14d5   :  { %2211 = vmatprep.mubr.msk.f32.mxu1 %vm2303_vm0, %v2302_v1  ;;  %2196 = vmatpush3.msra.mxu1 %v1721_v45 }
0x14d6   :  { %2197 = vmatprep.subr.mxu1 %v2302_v1 }
0x14d7   :  { %2198 = vmatpush3.msra.mxu1 %v1720_v47 }
0x14d8   :  { %2199 = vmatprep.subr.mxu1 %v2302_v1 }
0x14d9   :  { %2200 = vmatpush3.msra.mxu1 %v1719_v49 }
0x14da   :  { %2201 = vmatprep.subr.mxu1 %v2302_v1 }
0x14db   :  { %2202 = vmatpush3.msra.mxu1 %v1718_v51 }
0x14dc   :  { %2203 = vmatprep.subr.mxu1 %v2302_v1 }
0x14dd   :  { %2204 = vmatpush3.msra.mxu1 %v1717_v54 }
0x14de   :  { %2205 = vmatprep.subr.mxu1 %v2302_v1 }
0x14df   :  { %v2273_v2 = vpop.eup %2272  ;;  %2206 = vmatpush3.msra.mxu1 %v1716_v50 }
0x14e0   :  { %1253 = vrot.lane.b32.xlu1 %v2273_v2, %s2305_s8  ;;  %2207 = vmatprep.subr.mxu1 %v2302_v1 }
0x14e1   :  { %2208 = vmatpush3.msra.mxu1 %v1715_v41 }
0x14e2   :  { %2209 = vmatprep.subr.mxu1 %v2302_v1 }
0x1504   :  { %151 = vadd.xlane.f32.xlu1 %v150_v3 }
0x1552   :  { %v1254_v10 = vpop.permute.xlu1 %1253 }
0x1553   :  { %v1256_v17 = vmul.f32 %v1254_v10, %v1251_v13 }
0x1555   :  { %v1258_v18 = vadd.f32 %v1257_v14, %v1256_v17 }
0x1557   :  { %1461 = vrot.lane.b32.xlu0 %v1258_v18, %s2305_s8 }
0x155b   :  { %1438 = vperm.xlu0 %2223, %v1434_v19  }
0x155f   :  { %2225 = vset.pattern.permute.xlu0 %v2306_v20 }
0x1560   :  { %1447 = vperm.xlu0 %2225, %v1434_v19  }
0x158d   :  { %v152_v55 = vpop.xlane.xlu1 %151 }
0x158e   :  { %v153_v48 = vmax.f32 %v152_v55, 1.0 }
0x1590   :  { %2274 = vrcp.f32 %v153_v48 }
0x1594   :  { %v1609_v35 = vpop.f32.mrf.mxu1 }
0x1596   :  { %v2159_v37 = vpop.f32.mrf.mxu1 }
0x159d   :  { %v2275_v59 = vpop.eup %2274 }
0x159e   :  { %v236_v31 = vmul.f32 %v2275_v59, %v2549_v43  ;;  %v1714_v43 = vld [vmem:[#allocation2 + $0x1c8] sm:$0xff] }
0x159f   :  { %2210 = vmatpush3.msra.mxu1 %v1714_v43 }
0x15c9   :  { %v1462_v22 = vpop.permute.xlu0 %1461 }
0x15ca   :  { %2147 = vmatmul.mubr.msk.f32.vlgmr.msra.gmra.mxu0 %vm302_vm1, %v1462_v22 }
0x15cb   :  { %2161 = vmatpush3.msra.mxu0 %v1637_v21  ;;  %2192 = vmatprep.mubr.msk.f32.mxu0 %vm2303_vm0, %v2302_v1 }
0x15cc   :  { %2162 = vmatprep.subr.mxu0 %v2302_v1 }
0x15cd   :  { %2163 = vmatpush3.msra.mxu0 %v1636_v24 }
0x15ce   :  { %2164 = vmatprep.subr.mxu0 %v2302_v1 }
0x15cf   :  { %2165 = vmatpush3.msra.mxu0 %v1635_v26 }
0x15d0   :  { %2166 = vmatprep.subr.mxu0 %v2302_v1 }
0x15d1   :  { %2167 = vmatpush3.msra.mxu0 %v1634_v27 }
0x15d2   :  { %2168 = vmatprep.subr.mxu0 %v2302_v1 }
0x15d3   :  { %2169 = vmatpush3.msra.mxu0 %v1633_v53 }
0x15d4   :  { %2170 = vmatprep.subr.mxu0 %v2302_v1 }
0x15d5   :  { %2171 = vmatpush3.msra.mxu0 %v1632_v42 }
0x15d6   :  { %2172 = vmatprep.subr.mxu0 %v2302_v1  ;;  %v1439_v23 = vpop.permute.xlu0 %1438 }
0x15d7   :  { %2173 = vmatpush3.msra.mxu0 %v1631_v29  ;;  %v1445_v63 = vmul.f32 %v1444_v60, %v1439_v23 }
0x15d8   :  { %2174 = vmatprep.subr.mxu0 %v2302_v1 }
0x15d9   :  { %2175 = vmatpush3.msra.mxu0 %v1630_v30 }
0x15da   :  { %2176 = vmatprep.subr.mxu0 %v2302_v1 }
0x15db   :  { %2177 = vmatpush3.msra.mxu0 %v1629_v32  ;;  %v1448_v28 = vpop.permute.xlu0 %1447 }
0x15dc   :  { %2178 = vmatprep.subr.mxu0 %v2302_v1  ;;  %v1454_v61 = vmul.f32 %v1453_v25, %v1448_v28 }
0x15dd   :  { %2179 = vmatpush3.msra.mxu0 %v1628_v33 }
0x15de   :  { %2180 = vmatprep.subr.mxu0 %v2302_v1  ;;  %v1455_v4 = vadd.f32 %v1454_v61, %v1445_v63 }
0x15df   :  { %2181 = vmatpush3.msra.mxu0 %v1627_v34 }
0x15e0   :  { %2182 = vmatprep.subr.mxu0 %v2302_v1 }
0x15e1   :  { %2183 = vmatpush3.msra.mxu0 %v1626_v36 }
0x15e2   :  { %2184 = vmatprep.subr.mxu0 %v2302_v1 }
0x15e3   :  { %2185 = vmatpush3.msra.mxu0 %v1625_v38 }
0x15e4   :  { %2186 = vmatprep.subr.mxu0 %v2302_v1 }
0x15e5   :  { %2187 = vmatpush3.msra.mxu0 %v1624_v40 }
0x15e6   :  { %2188 = vmatprep.subr.mxu0 %v2302_v1 }
0x15e7   :  { %2189 = vmatpush3.msra.mxu0 %v1623_v16 }
0x15e8   :  { %2190 = vmatprep.subr.mxu0 %v2302_v1 }
0x15e9   :  { %2191 = vmatpush3.msra.mxu0 %v1622_v39 }
0x168a   :  { %v1531_v62 = vpop.f32.mrf.mxu0 }
0x168b   :  { %v1535_v2 = vadd.f32 %v1531_v62, %v236_v31 }
0x168c   :  { %v2148_v3 = vpop.f32.mrf.mxu0 }
0x168d   :  { %v1613_v0 = vadd.f32 %v1609_v35, %v1535_v2 }
0x168f   :  { %v1614_v44 = vadd.f32 %v1613_v0, %v1455_v4 }
0x1691   :  { %v1620_v15 = vadd.f32 %v1854_v6, %v1614_v44 }
0x1693   :  { %v1621_v5 = vmax.f32 %v1620_v15, 0.0 }
0x1695   :  { %2193 = vmatmul.mubr.f32.vlgmr.msra.gmra.mxu0 %v1621_v5 }
0x1755   :  { %v1709_v7 = vpop.f32.mrf.mxu0 }
0x1756   :  { %v1710_v8 = vadd.f32 %v1855_v46, %v1709_v7 }
0x1757   :  { %v2194_v9 = vpop.f32.mrf.mxu0 }
0x1758   :  { %v1713_v11 = vmax.f32 %v1710_v8, 0.0 }
0x175a   :  { %2212 = vmatmul.mubr.msk.f32.vlgmr.msra.gmra.mxu1 %vm149_vm14, %v1713_v11 }
0x181a   :  { %v1796_v13 = vpop.f32.mrf.mxu1 }
0x181b   :  { %v1797_v10 = vadd.f32 %v1856_v12, %v1796_v13 }
0x181c   :  { %v2213_v14 = vpop.f32.mrf.mxu1 }
0x181d   :  { %1800 = vst [vmem:[%s2717_s3] sm:$0xff] %v1797_v10 }
0x181e   :  { %1805 = vsyncpa [#allocation3], 1 }

</bundles_post_ra>
